<compile_context>
chip_gen: v7x
topology: tpu7x:2x2x1
jax: 0.10.0
libtpu: 0.0.40
codegen_flags: <defaults>
</compile_context>

<pallas_src>
import math
from functools import partial

import jax
import jax.numpy as jnp
from jax.experimental import pallas as pl
from jax.experimental.pallas import tpu as pltpu


# ---------------------------------------------------------------------------
# Small in-kernel helpers (bf16 MXU inputs, f32 accumulation, f32 statistics)
# ---------------------------------------------------------------------------

def _mm(a, b):
    """a @ b on the MXU with bf16 inputs, f32 accumulation."""
    return jnp.dot(a.astype(jnp.bfloat16), b.astype(jnp.bfloat16),
                   preferred_element_type=jnp.float32)


def _mm_nt(a, b):
    """a @ b.T without materializing the transpose (contract last dims)."""
    return jax.lax.dot_general(
        a.astype(jnp.bfloat16), b.astype(jnp.bfloat16),
        dimension_numbers=(((1,), (1,)), ((), ())),
        preferred_element_type=jnp.float32)


def _mm_tn(a, b):
    """a.T @ b without materializing the transpose (contract first dims)."""
    return jax.lax.dot_general(
        a.astype(jnp.bfloat16), b.astype(jnp.bfloat16),
        dimension_numbers=(((0,), (0,)), ((), ())),
        preferred_element_type=jnp.float32)


def _layernorm(x, g, b):
    """LayerNorm over the last dim in f32 (torch eps=1e-5)."""
    mu = jnp.mean(x, axis=-1, keepdims=True)
    var = jnp.mean((x - mu) ** 2, axis=-1, keepdims=True)
    return (x - mu) * jax.lax.rsqrt(var + 1e-5) * g + b


# ---------------------------------------------------------------------------
# Kernel 1: fused eigenvalue transformer branch  (e -> new_e)
#   SineEncoding + eig_w + LN + custom MHA + residual + LN + FFN + residual
#   + decoder, all resident in VMEM.
# ---------------------------------------------------------------------------

def eig_transformer_kernel(e_ref, div_ref,
                           we_ref, wssin_ref, wscos_ref, wb_ref,
                           ln1g_ref, ln1b_ref,
                           wq_ref, bq_ref, wk_ref, bk_ref, wv_ref, bv_ref,
                           wo_ref, bo_ref,
                           ln2g_ref, ln2b_ref,
                           f1w_ref, f1b_ref, f2w_ref, f2b_ref,
                           dw_ref, db_ref,
                           newe_ref, *, nheads):
    # --- SineEncoding (EUP sin/cos; no HBM round trip, no (hidden+1) tensor) ---
    e = e_ref[...]                                   # (N, 1) f32
    pe = (e * 100.0) * div_ref[...]                  # (N, hidden/2)
    sin_pe = jnp.sin(pe)
    cos_pe = jnp.cos(pe)

    # eig_w: [e | sin | cos] @ W + b with W split row-wise.
    eigw = (e * we_ref[...]
            + _mm(sin_pe, wssin_ref[...])
            + _mm(cos_pe, wscos_ref[...])
            + wb_ref[...])                           # (N, hidden) f32

    # --- mha_norm -> CustomMultiheadAttention (eval: dropout = identity) ---
    xin = _layernorm(eigw, ln1g_ref[...], ln1b_ref[...])
    q = _mm(xin, wq_ref[...]) + bq_ref[...]
    k = _mm(xin, wk_ref[...]) + bk_ref[...]
    v = _mm(xin, wv_ref[...]) + bv_ref[...]

    d = q.shape[1]
    hd = d // nheads
    scale = 1.0 / (hd ** 0.5)

    # relative-position scores: sim @ sim.T == sin@sin.T + cos@cos.T (scaled,
    # matching the PyTorch reference which scales the bias by 1/sqrt(head_dim)).
    rel = (_mm_nt(sin_pe, sin_pe) + _mm_nt(cos_pe, cos_pe)) * scale   # (N, N)

    wo = wo_ref[...]
    mha_out = bo_ref[...]                            # (1, hidden) bias, broadcasts
    for h in range(nheads):                          # static loop; concat folded
        qh = q[:, h * hd:(h + 1) * hd]               # into per-head Wo row-blocks
        kh = k[:, h * hd:(h + 1) * hd]
        vh = v[:, h * hd:(h + 1) * hd]
        s = _mm_nt(qh, kh) * scale + rel             # (N, N) f32
        s = s - jnp.max(s, axis=-1, keepdims=True)
        p = jnp.exp(s)
        p = p * pl.reciprocal(jnp.sum(p, axis=-1, keepdims=True), approx=True)
        oh = _mm(p, vh)                              # (N, hd)
        mha_out = mha_out + _mm(oh, wo[h * hd:(h + 1) * hd, :])

    eig = eigw + mha_out                             # residual 1

    # --- ffn_norm -> FFN (Linear -> GELU -> Linear), residual 2 ---
    y = _layernorm(eig, ln2g_ref[...], ln2b_ref[...])
    hmid = _mm(y, f1w_ref[...]) + f1b_ref[...]
    hmid = 0.5 * hmid * (1.0 + jax.lax.erf(hmid * 0.7071067811865476))  # exact GELU
    eig = eig + _mm(hmid, f2w_ref[...]) + f2b_ref[...]

    # --- decoder: per-head new eigenvalues ---
    newe_ref[...] = (_mm(eig, dw_ref[...]) + db_ref[...]).astype(newe_ref.dtype)


# ---------------------------------------------------------------------------
# Kernel 2: fused node branch + all spectral conv layers  (x, u, new_e -> h)
#   feat_encoder MLP, then nlayer SpecLayers with u resident in VMEM.
# ---------------------------------------------------------------------------

def feat_spec_kernel(x_ref, u_ref, newe_ref,
                     fw1_ref, fb1_ref, fw2_ref, fb2_ref, sw_ref,
                     h_ref, *, nlayer, nheads):
    # feat_encoder: Linear -> ReLU -> Linear (feat dropouts are identity in eval)
    t = _mm(x_ref[...], fw1_ref[...]) + fb1_ref[...]
    t = jnp.maximum(t, 0.0)
    h = _mm(t, fw2_ref[...]) + fb2_ref[...]          # (N, nclass) f32

    u = u_ref[...].astype(jnp.bfloat16)              # (N, N), resident across layers
    new_e = newe_ref[...]                            # (N, nheads) f32
    sw = sw_ref[...]                                 # (nlayer*(nheads+1), nclass)

    for l in range(nlayer):
        w = sw[l * (nheads + 1):(l + 1) * (nheads + 1), :]   # (nheads+1, nclass)
        utx = _mm_tn(u, h)                           # u^T @ h, no transpose copy
        # Linearity:  sum_i (u @ (new_e[:,i]*utx)) * w[i+1,:]
        #           = u @ ((sum_i new_e[:,i:i+1] * w[i+1,:]) * utx)
        scale = new_e[:, 0:1] * w[1:2, :]
        for i in range(1, nheads):
            scale = scale + new_e[:, i:i + 1] * w[i + 1:i + 2, :]
        h = h * w[0:1, :] + _mm(u, scale * utx)      # single u @ X per layer

    h_ref[...] = h.astype(h_ref.dtype)


# ---------------------------------------------------------------------------
# pallas_call helper (single whole-array VMEM blocks; shapes here are tiny)
# ---------------------------------------------------------------------------

def _vmem_specs(n):
    return [pl.BlockSpec(memory_space=pltpu.MemorySpace.VMEM) for _ in range(n)]


def _call(kernel, out_shape, *args):
    return pl.pallas_call(
        kernel,
        out_shape=out_shape,
        in_specs=_vmem_specs(len(args)),
        out_specs=pl.BlockSpec(memory_space=pltpu.MemorySpace.VMEM),
        compiler_params=pltpu.CompilerParams(vmem_limit_bytes=64 * 1024 * 1024),
    )(*args)


# ---------------------------------------------------------------------------
# Parameters (deterministic; shapes follow the PyTorch __init__, norm='none')
# ---------------------------------------------------------------------------

def init_params(key, *, nfeat, hidden, nclass, nheads, nlayer, fexp):
    ks = jax.random.split(key, 16)

    def lin(k, fan_in, fan_out):
        k1, k2 = jax.random.split(k)
        bound = 1.0 / math.sqrt(fan_in)
        w = jax.random.uniform(k1, (fan_in, fan_out), jnp.float32, -bound, bound)
        b = jax.random.uniform(k2, (1, fan_out), jnp.float32, -bound, bound)
        return w, b

    p = {}
    p["fe_w1"], p["fe_b1"] = lin(ks[0], nfeat, hidden)         # feat_encoder[0]
    p["fe_w2"], p["fe_b2"] = lin(ks[1], hidden, nclass)        # feat_encoder[2]
    p["eigw_w"], p["eigw_b"] = lin(ks[2], hidden + 1, hidden)  # eig_w
    p["mhanorm_g"] = jnp.ones((1, hidden), jnp.float32)
    p["mhanorm_b"] = jnp.zeros((1, hidden), jnp.float32)
    p["wq"], p["bq"] = lin(ks[3], hidden, hidden)
    p["wk"], p["bk"] = lin(ks[4], hidden, hidden)
    p["wv"], p["bv"] = lin(ks[5], hidden, hidden)
    p["wo"], p["bo"] = lin(ks[6], hidden, hidden)
    p["ffnnorm_g"] = jnp.ones((1, hidden), jnp.float32)
    p["ffnnorm_b"] = jnp.zeros((1, hidden), jnp.float32)
    p["ffn_w1"], p["ffn_b1"] = lin(ks[7], hidden, fexp * hidden)
    p["ffn_w2"], p["ffn_b2"] = lin(ks[8], fexp * hidden, hidden)
    p["dec_w"], p["dec_b"] = lin(ks[9], hidden, nheads)        # decoder
    for l in range(nlayer):                                    # SpecLayer (norm='none')
        p[f"spec_w_{l}"] = jnp.ones((nheads + 1, nclass), jnp.float32)
    return p


# ---------------------------------------------------------------------------
# Specformer forward (norm='none' branch, eval mode -> all dropouts identity)
# ---------------------------------------------------------------------------

def specformer_forward(params, e, u, x, *, hidden_dim, nheads, nlayer):
    assert hidden_dim % nheads == 0, "hidden_dim must be divisible by nheads"
    N = e.shape[0]
    nclass = params["fe_w2"].shape[1]
    half = hidden_dim // 2

    e2d = e.reshape(N, 1)
    div = jnp.exp(jnp.arange(0, hidden_dim, 2, dtype=jnp.float32)
                  * (-math.log(10000.0) / hidden_dim)).reshape(1, half)

    # Split eig_w weight row-wise: row 0 multiplies e, then sin rows, cos rows.
    we = params["eigw_w"][0:1, :]                # (1, hidden)
    ws_sin = params["eigw_w"][1:1 + half, :]     # (hidden/2, hidden)
    ws_cos = params["eigw_w"][1 + half:, :]      # (hidden/2, hidden)

    # --- Kernel 1: eigenvalue transformer branch -> new_e (N, nheads) ---
    new_e = _call(
        partial(eig_transformer_kernel, nheads=nheads),
        jax.ShapeDtypeStruct((N, nheads), jnp.float32),
        e2d, div, we, ws_sin, ws_cos, params["eigw_b"],
        params["mhanorm_g"], params["mhanorm_b"],
        params["wq"], params["bq"], params["wk"], params["bk"],
        params["wv"], params["bv"], params["wo"], params["bo"],
        params["ffnnorm_g"], params["ffnnorm_b"],
        params["ffn_w1"], params["ffn_b1"], params["ffn_w2"], params["ffn_b2"],
        params["dec_w"], params["dec_b"])

    # --- Kernel 2: feat_encoder + all spectral conv layers -> h (N, nclass) ---
    spec_w = jnp.concatenate([params[f"spec_w_{l}"] for l in range(nlayer)], axis=0)
    h = _call(
        partial(feat_spec_kernel, nlayer=nlayer, nheads=nheads),
        jax.ShapeDtypeStruct((N, nclass), jnp.float32),
        x, u, new_e,
        params["fe_w1"], params["fe_b1"], params["fe_w2"], params["fe_b2"],
        spec_w)
    return h


# ---------------------------------------------------------------------------
# main
# ---------------------------------------------------------------------------

if __name__ == "__main__":
    N, NFEAT, HIDDEN, NCLASS, NHEADS, NLAYER, FEXP = 8, 16, 32, 4, 1, 1, 2

    key = jax.random.PRNGKey(0)
    k_e, k_u, k_x, k_p = jax.random.split(key, 4)

    e = jax.random.uniform(k_e, (N,), jnp.float32, minval=-1.0, maxval=1.0)
    u = jax.random.normal(k_u, (N, N), jnp.float32) / math.sqrt(N)
    x = jax.random.normal(k_x, (N, NFEAT), jnp.float32)

    params = init_params(k_p, nfeat=NFEAT, hidden=HIDDEN, nclass=NCLASS,
                         nheads=NHEADS, nlayer=NLAYER, fexp=FEXP)

    out = specformer_forward(params, e, u, x,
                             hidden_dim=HIDDEN, nheads=NHEADS, nlayer=NLAYER)
    out = jax.block_until_ready(out)
    assert out.shape == (N, NCLASS) and bool(jnp.all(jnp.isfinite(out)))
    print("KERNEL_OK")
</pallas_src>

<mosaic_0001>
module attributes {stable_mosaic.version = 11 : i64} {
  func.func @eig_transformer_kernel(%arg0: memref<8x1xf32, #tpu.memory_space<vmem>>, %arg1: memref<1x16xf32, #tpu.memory_space<vmem>>, %arg2: memref<1x32xf32, #tpu.memory_space<vmem>>, %arg3: memref<16x32xf32, #tpu.memory_space<vmem>>, %arg4: memref<16x32xf32, #tpu.memory_space<vmem>>, %arg5: memref<1x32xf32, #tpu.memory_space<vmem>>, %arg6: memref<1x32xf32, #tpu.memory_space<vmem>>, %arg7: memref<1x32xf32, #tpu.memory_space<vmem>>, %arg8: memref<32x32xf32, #tpu.memory_space<vmem>>, %arg9: memref<1x32xf32, #tpu.memory_space<vmem>>, %arg10: memref<32x32xf32, #tpu.memory_space<vmem>>, %arg11: memref<1x32xf32, #tpu.memory_space<vmem>>, %arg12: memref<32x32xf32, #tpu.memory_space<vmem>>, %arg13: memref<1x32xf32, #tpu.memory_space<vmem>>, %arg14: memref<32x32xf32, #tpu.memory_space<vmem>>, %arg15: memref<1x32xf32, #tpu.memory_space<vmem>>, %arg16: memref<1x32xf32, #tpu.memory_space<vmem>>, %arg17: memref<1x32xf32, #tpu.memory_space<vmem>>, %arg18: memref<32x64xf32, #tpu.memory_space<vmem>>, %arg19: memref<1x64xf32, #tpu.memory_space<vmem>>, %arg20: memref<64x32xf32, #tpu.memory_space<vmem>>, %arg21: memref<1x32xf32, #tpu.memory_space<vmem>>, %arg22: memref<32x1xf32, #tpu.memory_space<vmem>>, %arg23: memref<1x1xf32, #tpu.memory_space<vmem>>, %arg24: memref<8x1xf32, #tpu.memory_space<vmem>>) attributes {dimension_semantics = [], scalar_prefetch = 0 : i64, scratch_operands = 0 : i64, tpu.core_type = #tpu.core_type<tc>} {
    %c0 = arith.constant 0 : index
    %c0_0 = arith.constant 0 : index
    %0 = vector.load %arg0[%c0, %c0_0] : memref<8x1xf32, #tpu.memory_space<vmem>>, vector<8x1xf32>
    %cst = arith.constant 1.000000e+02 : f32
    %1 = vector.broadcast %cst : f32 to vector<8x1xf32>
    %2 = arith.mulf %0, %1 : vector<8x1xf32>
    %c0_1 = arith.constant 0 : index
    %c0_2 = arith.constant 0 : index
    %3 = vector.load %arg1[%c0_1, %c0_2] : memref<1x16xf32, #tpu.memory_space<vmem>>, vector<1x16xf32>
    %4 = vector.broadcast %2 : vector<8x1xf32> to vector<8x16xf32>
    %5 = vector.broadcast %3 : vector<1x16xf32> to vector<8x16xf32>
    %6 = arith.mulf %4, %5 : vector<8x16xf32>
    %7 = math.sin %6 : vector<8x16xf32>
    %8 = math.cos %6 : vector<8x16xf32>
    %c0_3 = arith.constant 0 : index
    %c0_4 = arith.constant 0 : index
    %9 = vector.load %arg2[%c0_3, %c0_4] : memref<1x32xf32, #tpu.memory_space<vmem>>, vector<1x32xf32>
    %10 = vector.broadcast %0 : vector<8x1xf32> to vector<8x32xf32>
    %11 = vector.broadcast %9 : vector<1x32xf32> to vector<8x32xf32>
    %12 = arith.mulf %10, %11 : vector<8x32xf32>
    %c0_5 = arith.constant 0 : index
    %c0_6 = arith.constant 0 : index
    %13 = vector.load %arg3[%c0_5, %c0_6] : memref<16x32xf32, #tpu.memory_space<vmem>>, vector<16x32xf32>
    %14 = arith.truncf %7 : vector<8x16xf32> to vector<8x16xbf16>
    %15 = arith.truncf %13 : vector<16x32xf32> to vector<16x32xbf16>
    %cst_7 = arith.constant dense<0.000000e+00> : vector<8x32xf32>
    %16 = tpu.matmul %14, %15, %cst_7 {dimension_numbers = #tpu.dot_dimension_numbers<[1], [0], [0], [1], [0, 0, 1, 1], [], []>} : vector<8x16xbf16>, vector<16x32xbf16>, vector<8x32xf32> -> vector<8x32xf32>
    %17 = arith.addf %12, %16 : vector<8x32xf32>
    %c0_8 = arith.constant 0 : index
    %c0_9 = arith.constant 0 : index
    %18 = vector.load %arg4[%c0_8, %c0_9] : memref<16x32xf32, #tpu.memory_space<vmem>>, vector<16x32xf32>
    %19 = arith.truncf %8 : vector<8x16xf32> to vector<8x16xbf16>
    %20 = arith.truncf %18 : vector<16x32xf32> to vector<16x32xbf16>
    %cst_10 = arith.constant dense<0.000000e+00> : vector<8x32xf32>
    %21 = tpu.matmul %19, %20, %cst_10 {dimension_numbers = #tpu.dot_dimension_numbers<[1], [0], [0], [1], [0, 0, 1, 1], [], []>} : vector<8x16xbf16>, vector<16x32xbf16>, vector<8x32xf32> -> vector<8x32xf32>
    %22 = arith.addf %17, %21 : vector<8x32xf32>
    %c0_11 = arith.constant 0 : index
    %c0_12 = arith.constant 0 : index
    %23 = vector.load %arg5[%c0_11, %c0_12] : memref<1x32xf32, #tpu.memory_space<vmem>>, vector<1x32xf32>
    %24 = vector.broadcast %23 : vector<1x32xf32> to vector<8x32xf32>
    %25 = arith.addf %22, %24 : vector<8x32xf32>
    %c0_13 = arith.constant 0 : index
    %c0_14 = arith.constant 0 : index
    %26 = vector.load %arg6[%c0_13, %c0_14] : memref<1x32xf32, #tpu.memory_space<vmem>>, vector<1x32xf32>
    %c0_15 = arith.constant 0 : index
    %c0_16 = arith.constant 0 : index
    %27 = vector.load %arg7[%c0_15, %c0_16] : memref<1x32xf32, #tpu.memory_space<vmem>>, vector<1x32xf32>
    %cst_17 = arith.constant dense<0.000000e+00> : vector<8xf32>
    %28 = vector.multi_reduction <add>, %25, %cst_17 [1] : vector<8x32xf32> to vector<8xf32>
    %29 = vector.shape_cast %28 : vector<8xf32> to vector<8x1xf32>
    %cst_18 = arith.constant 3.200000e+01 : f32
    %30 = vector.broadcast %cst_18 : f32 to vector<8x1xf32>
    %31 = arith.divf %29, %30 : vector<8x1xf32>
    %32 = vector.broadcast %31 : vector<8x1xf32> to vector<8x32xf32>
    %33 = arith.subf %25, %32 : vector<8x32xf32>
    %34 = arith.mulf %33, %33 : vector<8x32xf32>
    %cst_19 = arith.constant dense<0.000000e+00> : vector<8xf32>
    %35 = vector.multi_reduction <add>, %34, %cst_19 [1] : vector<8x32xf32> to vector<8xf32>
    %36 = vector.shape_cast %35 : vector<8xf32> to vector<8x1xf32>
    %cst_20 = arith.constant 3.200000e+01 : f32
    %37 = vector.broadcast %cst_20 : f32 to vector<8x1xf32>
    %38 = arith.divf %36, %37 : vector<8x1xf32>
    %39 = vector.broadcast %31 : vector<8x1xf32> to vector<8x32xf32>
    %40 = arith.subf %25, %39 : vector<8x32xf32>
    %cst_21 = arith.constant 9.99999974E-6 : f32
    %41 = vector.broadcast %cst_21 : f32 to vector<8x1xf32>
    %42 = arith.addf %38, %41 : vector<8x1xf32>
    %43 = math.rsqrt %42 : vector<8x1xf32>
    %44 = vector.broadcast %43 : vector<8x1xf32> to vector<8x32xf32>
    %45 = arith.mulf %40, %44 : vector<8x32xf32>
    %46 = vector.broadcast %26 : vector<1x32xf32> to vector<8x32xf32>
    %47 = arith.mulf %45, %46 : vector<8x32xf32>
    %48 = vector.broadcast %27 : vector<1x32xf32> to vector<8x32xf32>
    %49 = arith.addf %47, %48 : vector<8x32xf32>
    %c0_22 = arith.constant 0 : index
    %c0_23 = arith.constant 0 : index
    %50 = vector.load %arg8[%c0_22, %c0_23] : memref<32x32xf32, #tpu.memory_space<vmem>>, vector<32x32xf32>
    %51 = arith.truncf %49 : vector<8x32xf32> to vector<8x32xbf16>
    %52 = arith.truncf %50 : vector<32x32xf32> to vector<32x32xbf16>
    %cst_24 = arith.constant dense<0.000000e+00> : vector<8x32xf32>
    %53 = tpu.matmul %51, %52, %cst_24 {dimension_numbers = #tpu.dot_dimension_numbers<[1], [0], [0], [1], [0, 0, 1, 1], [], []>} : vector<8x32xbf16>, vector<32x32xbf16>, vector<8x32xf32> -> vector<8x32xf32>
    %c0_25 = arith.constant 0 : index
    %c0_26 = arith.constant 0 : index
    %54 = vector.load %arg9[%c0_25, %c0_26] : memref<1x32xf32, #tpu.memory_space<vmem>>, vector<1x32xf32>
    %55 = vector.broadcast %54 : vector<1x32xf32> to vector<8x32xf32>
    %56 = arith.addf %53, %55 : vector<8x32xf32>
    %c0_27 = arith.constant 0 : index
    %c0_28 = arith.constant 0 : index
    %57 = vector.load %arg10[%c0_27, %c0_28] : memref<32x32xf32, #tpu.memory_space<vmem>>, vector<32x32xf32>
    %58 = arith.truncf %49 : vector<8x32xf32> to vector<8x32xbf16>
    %59 = arith.truncf %57 : vector<32x32xf32> to vector<32x32xbf16>
    %cst_29 = arith.constant dense<0.000000e+00> : vector<8x32xf32>
    %60 = tpu.matmul %58, %59, %cst_29 {dimension_numbers = #tpu.dot_dimension_numbers<[1], [0], [0], [1], [0, 0, 1, 1], [], []>} : vector<8x32xbf16>, vector<32x32xbf16>, vector<8x32xf32> -> vector<8x32xf32>
    %c0_30 = arith.constant 0 : index
    %c0_31 = arith.constant 0 : index
    %61 = vector.load %arg11[%c0_30, %c0_31] : memref<1x32xf32, #tpu.memory_space<vmem>>, vector<1x32xf32>
    %62 = vector.broadcast %61 : vector<1x32xf32> to vector<8x32xf32>
    %63 = arith.addf %60, %62 : vector<8x32xf32>
    %c0_32 = arith.constant 0 : index
    %c0_33 = arith.constant 0 : index
    %64 = vector.load %arg12[%c0_32, %c0_33] : memref<32x32xf32, #tpu.memory_space<vmem>>, vector<32x32xf32>
    %65 = arith.truncf %49 : vector<8x32xf32> to vector<8x32xbf16>
    %66 = arith.truncf %64 : vector<32x32xf32> to vector<32x32xbf16>
    %cst_34 = arith.constant dense<0.000000e+00> : vector<8x32xf32>
    %67 = tpu.matmul %65, %66, %cst_34 {dimension_numbers = #tpu.dot_dimension_numbers<[1], [0], [0], [1], [0, 0, 1, 1], [], []>} : vector<8x32xbf16>, vector<32x32xbf16>, vector<8x32xf32> -> vector<8x32xf32>
    %c0_35 = arith.constant 0 : index
    %c0_36 = arith.constant 0 : index
    %68 = vector.load %arg13[%c0_35, %c0_36] : memref<1x32xf32, #tpu.memory_space<vmem>>, vector<1x32xf32>
    %69 = vector.broadcast %68 : vector<1x32xf32> to vector<8x32xf32>
    %70 = arith.addf %67, %69 : vector<8x32xf32>
    %71 = arith.truncf %7 : vector<8x16xf32> to vector<8x16xbf16>
    %72 = arith.truncf %7 : vector<8x16xf32> to vector<8x16xbf16>
    %cst_37 = arith.constant dense<0.000000e+00> : vector<8x8xf32>
    %73 = tpu.matmul %71, %72, %cst_37 {dimension_numbers = #tpu.dot_dimension_numbers<[1], [1], [0], [0], [0, 0, 1, 0], [], []>} : vector<8x16xbf16>, vector<8x16xbf16>, vector<8x8xf32> -> vector<8x8xf32>
    %74 = arith.truncf %8 : vector<8x16xf32> to vector<8x16xbf16>
    %75 = arith.truncf %8 : vector<8x16xf32> to vector<8x16xbf16>
    %cst_38 = arith.constant dense<0.000000e+00> : vector<8x8xf32>
    %76 = tpu.matmul %74, %75, %cst_38 {dimension_numbers = #tpu.dot_dimension_numbers<[1], [1], [0], [0], [0, 0, 1, 0], [], []>} : vector<8x16xbf16>, vector<8x16xbf16>, vector<8x8xf32> -> vector<8x8xf32>
    %77 = arith.addf %73, %76 : vector<8x8xf32>
    %cst_39 = arith.constant 0.176776692 : f32
    %78 = vector.broadcast %cst_39 : f32 to vector<8x8xf32>
    %79 = arith.mulf %77, %78 : vector<8x8xf32>
    %c0_40 = arith.constant 0 : index
    %c0_41 = arith.constant 0 : index
    %80 = vector.load %arg14[%c0_40, %c0_41] : memref<32x32xf32, #tpu.memory_space<vmem>>, vector<32x32xf32>
    %c0_42 = arith.constant 0 : index
    %c0_43 = arith.constant 0 : index
    %81 = vector.load %arg15[%c0_42, %c0_43] : memref<1x32xf32, #tpu.memory_space<vmem>>, vector<1x32xf32>
    %82 = arith.truncf %56 : vector<8x32xf32> to vector<8x32xbf16>
    %83 = arith.truncf %63 : vector<8x32xf32> to vector<8x32xbf16>
    %cst_44 = arith.constant dense<0.000000e+00> : vector<8x8xf32>
    %84 = tpu.matmul %82, %83, %cst_44 {dimension_numbers = #tpu.dot_dimension_numbers<[1], [1], [0], [0], [0, 0, 1, 0], [], []>} : vector<8x32xbf16>, vector<8x32xbf16>, vector<8x8xf32> -> vector<8x8xf32>
    %cst_45 = arith.constant 0.176776692 : f32
    %85 = vector.broadcast %cst_45 : f32 to vector<8x8xf32>
    %86 = arith.mulf %84, %85 : vector<8x8xf32>
    %87 = arith.addf %86, %79 : vector<8x8xf32>
    %cst_46 = arith.constant dense<0xFF800000> : vector<8xf32>
    %88 = vector.multi_reduction <maximumf>, %87, %cst_46 [1] : vector<8x8xf32> to vector<8xf32>
    %89 = vector.shape_cast %88 : vector<8xf32> to vector<8x1xf32>
    %90 = vector.broadcast %89 : vector<8x1xf32> to vector<8x8xf32>
    %91 = arith.subf %87, %90 : vector<8x8xf32>
    %92 = math.exp %91 : vector<8x8xf32>
    %cst_47 = arith.constant dense<0.000000e+00> : vector<8xf32>
    %93 = vector.multi_reduction <add>, %92, %cst_47 [1] : vector<8x8xf32> to vector<8xf32>
    %94 = vector.shape_cast %93 : vector<8xf32> to vector<8x1xf32>
    %95 = tpu.reciprocal %94 {approx = true} : vector<8x1xf32> -> vector<8x1xf32>
    %96 = vector.broadcast %95 : vector<8x1xf32> to vector<8x8xf32>
    %97 = arith.mulf %92, %96 : vector<8x8xf32>
    %98 = arith.truncf %97 : vector<8x8xf32> to vector<8x8xbf16>
    %99 = arith.truncf %70 : vector<8x32xf32> to vector<8x32xbf16>
    %cst_48 = arith.constant dense<0.000000e+00> : vector<8x32xf32>
    %100 = tpu.matmul %98, %99, %cst_48 {dimension_numbers = #tpu.dot_dimension_numbers<[1], [0], [0], [1], [0, 0, 1, 1], [], []>} : vector<8x8xbf16>, vector<8x32xbf16>, vector<8x32xf32> -> vector<8x32xf32>
    %101 = arith.truncf %100 : vector<8x32xf32> to vector<8x32xbf16>
    %102 = arith.truncf %80 : vector<32x32xf32> to vector<32x32xbf16>
    %cst_49 = arith.constant dense<0.000000e+00> : vector<8x32xf32>
    %103 = tpu.matmul %101, %102, %cst_49 {dimension_numbers = #tpu.dot_dimension_numbers<[1], [0], [0], [1], [0, 0, 1, 1], [], []>} : vector<8x32xbf16>, vector<32x32xbf16>, vector<8x32xf32> -> vector<8x32xf32>
    %104 = vector.broadcast %81 : vector<1x32xf32> to vector<8x32xf32>
    %105 = arith.addf %104, %103 : vector<8x32xf32>
    %106 = arith.addf %25, %105 : vector<8x32xf32>
    %c0_50 = arith.constant 0 : index
    %c0_51 = arith.constant 0 : index
    %107 = vector.load %arg16[%c0_50, %c0_51] : memref<1x32xf32, #tpu.memory_space<vmem>>, vector<1x32xf32>
    %c0_52 = arith.constant 0 : index
    %c0_53 = arith.constant 0 : index
    %108 = vector.load %arg17[%c0_52, %c0_53] : memref<1x32xf32, #tpu.memory_space<vmem>>, vector<1x32xf32>
    %cst_54 = arith.constant dense<0.000000e+00> : vector<8xf32>
    %109 = vector.multi_reduction <add>, %106, %cst_54 [1] : vector<8x32xf32> to vector<8xf32>
    %110 = vector.shape_cast %109 : vector<8xf32> to vector<8x1xf32>
    %cst_55 = arith.constant 3.200000e+01 : f32
    %111 = vector.broadcast %cst_55 : f32 to vector<8x1xf32>
    %112 = arith.divf %110, %111 : vector<8x1xf32>
    %113 = vector.broadcast %112 : vector<8x1xf32> to vector<8x32xf32>
    %114 = arith.subf %106, %113 : vector<8x32xf32>
    %115 = arith.mulf %114, %114 : vector<8x32xf32>
    %cst_56 = arith.constant dense<0.000000e+00> : vector<8xf32>
    %116 = vector.multi_reduction <add>, %115, %cst_56 [1] : vector<8x32xf32> to vector<8xf32>
    %117 = vector.shape_cast %116 : vector<8xf32> to vector<8x1xf32>
    %cst_57 = arith.constant 3.200000e+01 : f32
    %118 = vector.broadcast %cst_57 : f32 to vector<8x1xf32>
    %119 = arith.divf %117, %118 : vector<8x1xf32>
    %120 = vector.broadcast %112 : vector<8x1xf32> to vector<8x32xf32>
    %121 = arith.subf %106, %120 : vector<8x32xf32>
    %cst_58 = arith.constant 9.99999974E-6 : f32
    %122 = vector.broadcast %cst_58 : f32 to vector<8x1xf32>
    %123 = arith.addf %119, %122 : vector<8x1xf32>
    %124 = math.rsqrt %123 : vector<8x1xf32>
    %125 = vector.broadcast %124 : vector<8x1xf32> to vector<8x32xf32>
    %126 = arith.mulf %121, %125 : vector<8x32xf32>
    %127 = vector.broadcast %107 : vector<1x32xf32> to vector<8x32xf32>
    %128 = arith.mulf %126, %127 : vector<8x32xf32>
    %129 = vector.broadcast %108 : vector<1x32xf32> to vector<8x32xf32>
    %130 = arith.addf %128, %129 : vector<8x32xf32>
    %c0_59 = arith.constant 0 : index
    %c0_60 = arith.constant 0 : index
    %131 = vector.load %arg18[%c0_59, %c0_60] : memref<32x64xf32, #tpu.memory_space<vmem>>, vector<32x64xf32>
    %132 = arith.truncf %130 : vector<8x32xf32> to vector<8x32xbf16>
    %133 = arith.truncf %131 : vector<32x64xf32> to vector<32x64xbf16>
    %cst_61 = arith.constant dense<0.000000e+00> : vector<8x64xf32>
    %134 = tpu.matmul %132, %133, %cst_61 {dimension_numbers = #tpu.dot_dimension_numbers<[1], [0], [0], [1], [0, 0, 1, 1], [], []>} : vector<8x32xbf16>, vector<32x64xbf16>, vector<8x64xf32> -> vector<8x64xf32>
    %c0_62 = arith.constant 0 : index
    %c0_63 = arith.constant 0 : index
    %135 = vector.load %arg19[%c0_62, %c0_63] : memref<1x64xf32, #tpu.memory_space<vmem>>, vector<1x64xf32>
    %136 = vector.broadcast %135 : vector<1x64xf32> to vector<8x64xf32>
    %137 = arith.addf %134, %136 : vector<8x64xf32>
    %cst_64 = arith.constant 5.000000e-01 : f32
    %138 = vector.broadcast %cst_64 : f32 to vector<8x64xf32>
    %139 = arith.mulf %138, %137 : vector<8x64xf32>
    %cst_65 = arith.constant 0.707106769 : f32
    %140 = vector.broadcast %cst_65 : f32 to vector<8x64xf32>
    %141 = arith.mulf %137, %140 : vector<8x64xf32>
    %142 = math.erf %141 : vector<8x64xf32>
    %cst_66 = arith.constant 1.000000e+00 : f32
    %143 = vector.broadcast %cst_66 : f32 to vector<8x64xf32>
    %144 = arith.addf %143, %142 : vector<8x64xf32>
    %145 = arith.mulf %139, %144 : vector<8x64xf32>
    %c0_67 = arith.constant 0 : index
    %c0_68 = arith.constant 0 : index
    %146 = vector.load %arg20[%c0_67, %c0_68] : memref<64x32xf32, #tpu.memory_space<vmem>>, vector<64x32xf32>
    %147 = arith.truncf %145 : vector<8x64xf32> to vector<8x64xbf16>
    %148 = arith.truncf %146 : vector<64x32xf32> to vector<64x32xbf16>
    %cst_69 = arith.constant dense<0.000000e+00> : vector<8x32xf32>
    %149 = tpu.matmul %147, %148, %cst_69 {dimension_numbers = #tpu.dot_dimension_numbers<[1], [0], [0], [1], [0, 0, 1, 1], [], []>} : vector<8x64xbf16>, vector<64x32xbf16>, vector<8x32xf32> -> vector<8x32xf32>
    %150 = arith.addf %106, %149 : vector<8x32xf32>
    %c0_70 = arith.constant 0 : index
    %c0_71 = arith.constant 0 : index
    %151 = vector.load %arg21[%c0_70, %c0_71] : memref<1x32xf32, #tpu.memory_space<vmem>>, vector<1x32xf32>
    %152 = vector.broadcast %151 : vector<1x32xf32> to vector<8x32xf32>
    %153 = arith.addf %150, %152 : vector<8x32xf32>
    %c0_72 = arith.constant 0 : index
    %c0_73 = arith.constant 0 : index
    %154 = vector.load %arg22[%c0_72, %c0_73] : memref<32x1xf32, #tpu.memory_space<vmem>>, vector<32x1xf32>
    %155 = arith.truncf %153 : vector<8x32xf32> to vector<8x32xbf16>
    %156 = arith.truncf %154 : vector<32x1xf32> to vector<32x1xbf16>
    %cst_74 = arith.constant dense<0.000000e+00> : vector<8x1xf32>
    %157 = tpu.matmul %155, %156, %cst_74 {dimension_numbers = #tpu.dot_dimension_numbers<[1], [0], [0], [1], [0, 0, 1, 1], [], []>} : vector<8x32xbf16>, vector<32x1xbf16>, vector<8x1xf32> -> vector<8x1xf32>
    %c0_75 = arith.constant 0 : index
    %c0_76 = arith.constant 0 : index
    %158 = vector.load %arg23[%c0_75, %c0_76] : memref<1x1xf32, #tpu.memory_space<vmem>>, vector<1x1xf32>
    %159 = vector.broadcast %158 : vector<1x1xf32> to vector<8x1xf32>
    %160 = arith.addf %157, %159 : vector<8x1xf32>
    %c0_77 = arith.constant 0 : index
    %c0_78 = arith.constant 0 : index
    %161 = vector.load %arg24[%c0_77, %c0_78] : memref<8x1xf32, #tpu.memory_space<vmem>>, vector<8x1xf32>
    tpu.vector_store %arg24[%c0_77, %c0_78], %160 {strides = array<i32>} : memref<8x1xf32, #tpu.memory_space<vmem>>, vector<8x1xf32>,
    return
  }
}

</mosaic_0001>

<bundles_post_ra>
// kernel: tpu_custom_call.1
= control target key start
LH: loop header
LB: loop body
LE: loop exit
PB: predicated region body
PF: predicated region fallthrough
CT: control target
= control target key end

     0   :  { %s2792_s0 = inlined_call_operand.hbm [shape: f32[8,1], index: 0, kind: input, shape index: {}]   ;;  %s2793_s1 = inlined_call_operand.hbm [shape: f32[1,16], index: 1, kind: input, shape index: {}]   ;;  %s2794_s2 = inlined_call_operand.hbm [shape: f32[1,32], index: 2, kind: input, shape index: {}]   ;;  %s2795_s3 = inlined_call_operand.hbm [shape: f32[16,32], index: 3, kind: input, shape index: {}]   ;;  %s2796_s4 = inlined_call_operand.hbm [shape: f32[16,32], index: 4, kind: input, shape index: {}]   ;;  %s2797_s5 = inlined_call_operand.hbm [shape: f32[1,32], index: 5, kind: input, shape index: {}]   ;;  %s2798_s6 = inlined_call_operand.hbm [shape: f32[1,32], index: 6, kind: input, shape index: {}]   ;;  %s2799_s7 = inlined_call_operand.hbm [shape: f32[1,32], index: 7, kind: input, shape index: {}]   ;;  %s2800_s8 = inlined_call_operand.hbm [shape: f32[32,32], index: 8, kind: input, shape index: {}]   ;;  %s2801_s9 = inlined_call_operand.hbm [shape: f32[1,32], index: 9, kind: input, shape index: {}]   ;;  %s2802_s10 = inlined_call_operand.hbm [shape: f32[32,32], index: 10, kind: input, shape index: {}]   ;;  %s2803_s11 = inlined_call_operand.hbm [shape: f32[1,32], index: 11, kind: input, shape index: {}]   ;;  %s2804_s12 = inlined_call_operand.hbm [shape: f32[32,32], index: 12, kind: input, shape index: {}]   ;;  %s2805_s13 = inlined_call_operand.hbm [shape: f32[1,32], index: 13, kind: input, shape index: {}]   ;;  %s2806_s14 = inlined_call_operand.hbm [shape: f32[32,32], index: 14, kind: input, shape index: {}]   ;;  %s2807_s15 = inlined_call_operand.hbm [shape: f32[1,32], index: 15, kind: input, shape index: {}]   ;;  %s2808_s16 = inlined_call_operand.hbm [shape: f32[1,32], index: 16, kind: input, shape index: {}]   ;;  %s2809_s17 = inlined_call_operand.hbm [shape: f32[1,32], index: 17, kind: input, shape index: {}]   ;;  %s2810_s18 = inlined_call_operand.hbm [shape: f32[32,64], index: 18, kind: input, shape index: {}]   ;;  %s2811_s19 = inlined_call_operand.hbm [shape: f32[1,64], index: 19, kind: input, shape index: {}]   ;;  %s2812_s20 = inlined_call_operand.hbm [shape: f32[64,32], index: 20, kind: input, shape index: {}]   ;;  %s2813_s21 = inlined_call_operand.hbm [shape: f32[1,32], index: 21, kind: input, shape index: {}]   ;;  %s2814_s22 = inlined_call_operand.hbm [shape: f32[32,1], index: 22, kind: input, shape index: {}]   ;;  %s2815_s23 = inlined_call_operand.<no memory space> [shape: f32[1,1], index: 23, kind: input, shape index: {}]   ;;  %s2816_s24 = inlined_call_operand.hbm [shape: f32[8,1], index: 24, kind: output, shape index: {}]  }
   0x1   :  { %2828 = sst [smem:[#allocation53_spill]] %s2792_s0  ;;  %v29_v0 = vstv %s2815_s23 }
   0x2   :  { %2829 = sst [smem:[#allocation54_spill]] %s2793_s1  ;;  %30 = vst [vmem:[#allocation2] sm:$0x1] %v29_v0 }
   0x3   :  { %2830 = sst [smem:[#allocation55_spill]] %s2794_s2 }
   0x4   :  { %2831 = sst [smem:[#allocation56_spill]] %s2795_s3 }
   0x5   :  { %2832 = sst [smem:[#allocation57_spill]] %s2796_s4 }
   0x6   :  { %2833 = sst [smem:[#allocation58_spill]] %s2797_s5 }
   0x7   :  { %2834 = sst [smem:[#allocation59_spill]] %s2798_s6 }
   0x8   :  { %2835 = sst [smem:[#allocation60_spill]] %s2799_s7 }
   0x9   :  { %2836 = sst [smem:[#allocation61_spill]] %s2800_s8 }
   0xa   :  { %2837 = sst [smem:[#allocation62_spill]] %s2814_s22 }
   0xb   :  { %2838 = sst [smem:[#allocation63_spill]] %s2816_s24 }
   0xc   :  { %31 = vsyncpa [#allocation4], 0 }
   0xd   :  { %32 = vsyncpa [#allocation7], 0 }
   0xe   :  { %33 = vsyncpa [#allocation10], 0 }
   0xf   :  { %34 = vsyncpa [#allocation13], 0 }
  0x10   :  { %35 = vsyncpa [#allocation16], 0 }
  0x11   :  { %36 = vsyncpa [#allocation19], 0 }
  0x12   :  { %37 = vsyncpa [#allocation22], 0 }
  0x13   :  { %38 = vsyncpa [#allocation25], 0 }
  0x14   :  { %39 = vsyncpa [#allocation28], 0 }
  0x15   :  { %40 = vsyncpa [#allocation31], 0 }
  0x16   :  { %41 = vsyncpa [#allocation34], 0 }
  0x17   :  { %42 = vsyncpa [#allocation37], 0 }
  0x18   :  { %43 = vsyncpa [#allocation5], 0  ;;  %s2169_s27 = smov [#allocation6]   ;;  %s2170_s6 = smov [#allocation9]  }
  0x19   :  { %s60_s28 = sshll.u32 %s2169_s27, 4  ;;  %s79_s2 = sshll.u32 %s2170_s6, 4  ;;  %s61_s28 = int_to_ptr.vmem [resolvable:$true] %s60_s28  ;;  %s2332_s2 = int_to_ptr.vmem [resolvable:$true] %s79_s2 }
  0x1a   :  { %s2839_s0 = sld [smem:[#allocation54_spill]] }
  0x20   :  { %s1615_s7 = scalar_lea.hbm %s2839_s0, 16 }
  0x21   :  { %p1616_p0 = scmp.ne.s32.totalorder %s2839_s0, %s1615_s7  ;;  %p1619_p1 = scmp.lt.u32.totalorder %s1615_s7, %s2839_s0 }
  0x23   :  { %p1621_p2 = pnand %p1619_p1, %p1616_p0 }
  0x25   :  { %1624 = shalt.err (!%p1621_p2)
}
  0x26   :  { %s1625_s4 = scalar_lea.vmem %s61_s28, 16  ;;  %s1629_s1 = scalar_lea.vmem %s61_s28, 32 }
  0x27   :  { %p1626_p3 = scmp.ne.s32.totalorder %s61_s28, %s1625_s4  ;;  %p1630_p4 = scmp.lt.s32.totalorder %s61_s28, %s61_s28 }
  0x28   :  { %p1631_p5 = scmp.lt.s32.totalorder %s1629_s1, %s1625_s4 }
  0x2a   :  { %p1632_p6 = por %p1631_p5, %p1630_p4 }
  0x2c   :  { %p1633_p7 = pnand %p1632_p6, %p1626_p3 }
  0x2e   :  { %1636 = shalt.err (!%p1633_p7)
}
  0x2f   :  { %63 = dma.hbm_to_vmem [thread:$0]  %s2839_s0, 16, %s61_s28, [#allocation7]  }
  0x30   :  { %s2840_s23 = sld [smem:[#allocation56_spill]] }
  0x36   :  { %s1637_s29 = scalar_lea.hbm %s2840_s23, 256 }
  0x37   :  { %p1638_p8 = scmp.ne.s32.totalorder %s2840_s23, %s1637_s29  ;;  %p1641_p9 = scmp.lt.u32.totalorder %s1637_s29, %s2840_s23 }
  0x39   :  { %p1643_p10 = pnand %p1641_p9, %p1638_p8 }
  0x3b   :  { %1646 = shalt.err (!%p1643_p10)
}
  0x3c   :  { %s1647_s8 = scalar_lea.vmem %s2332_s2, 256  ;;  %p1652_p12 = scmp.lt.s32.totalorder %s2332_s2, %s2332_s2 }
  0x3d   :  { %p1648_p11 = scmp.ne.s32.totalorder %s2332_s2, %s1647_s8  ;;  %p1653_p13 = scmp.lt.s32.totalorder %s1647_s8, %s1647_s8 }
  0x3f   :  { %p1654_p0 = por %p1653_p13, %p1652_p12 }
  0x41   :  { %p1655_p1 = pnand %p1654_p0, %p1648_p11 }
  0x43   :  { %1658 = shalt.err (!%p1655_p1)
}
  0x44   :  { %s2171_s28 = smov 128   ;;  %s2172_s0 = smov 8  }
  0x45   :  { %85 = dma.hbm_to_vmem [thread:$0]  %s2840_s23, 256, %s2332_s2, [#allocation10], %s2171_s28, %s2171_s28, %s2172_s0  }
  0x46   :  { %s2173_s5 = smov [#allocation12]   ;;  %s2174_s27 = smov [#allocation15]  }
  0x47   :  { %s104_s26 = sshll.u32 %s2173_s5, 4  ;;  %s124_s6 = sshll.u32 %s2174_s27, 4  ;;  %s105_s26 = int_to_ptr.vmem [resolvable:$true] %s104_s26  ;;  %s125_s6 = int_to_ptr.vmem [resolvable:$true] %s124_s6 }
  0x48   :  { %s2841_s7 = sld [smem:[#allocation58_spill]] }
  0x4e   :  { %s1659_s3 = scalar_lea.hbm %s2841_s7, 16 }
  0x4f   :  { %p1660_p2 = scmp.ne.s32.totalorder %s2841_s7, %s1659_s3  ;;  %p1663_p3 = scmp.lt.u32.totalorder %s1659_s3, %s2841_s7 }
  0x51   :  { %p1665_p4 = pnand %p1663_p3, %p1660_p2 }
  0x53   :  { %1668 = shalt.err (!%p1665_p4)
}
  0x54   :  { %s1669_s2 = scalar_lea.vmem %s105_s26, 16  ;;  %s1673_s23 = scalar_lea.vmem %s105_s26, 32 }
  0x55   :  { %p1670_p5 = scmp.ne.s32.totalorder %s105_s26, %s1669_s2  ;;  %p1674_p6 = scmp.lt.s32.totalorder %s105_s26, %s105_s26 }
  0x56   :  { %p1675_p7 = scmp.lt.s32.totalorder %s1673_s23, %s1669_s2 }
  0x58   :  { %p1676_p8 = por %p1675_p7, %p1674_p6 }
  0x5a   :  { %p1677_p9 = pnand %p1676_p8, %p1670_p5 }
  0x5c   :  { %1680 = shalt.err (!%p1677_p9)
}
  0x5d   :  { %107 = dma.hbm_to_vmem [thread:$0]  %s2841_s7, 16, %s105_s26, [#allocation13]  }
  0x5e   :  { %s2842_s29 = sld [smem:[#allocation60_spill]] }
  0x64   :  { %s1681_s30 = scalar_lea.hbm %s2842_s29, 16 }
  0x65   :  { %p1682_p10 = scmp.ne.s32.totalorder %s2842_s29, %s1681_s30  ;;  %p1685_p11 = scmp.lt.u32.totalorder %s1681_s30, %s2842_s29 }
  0x67   :  { %p1687_p12 = pnand %p1685_p11, %p1682_p10 }
  0x69   :  { %1690 = shalt.err (!%p1687_p12)
}
  0x6a   :  { %s1691_s8 = scalar_lea.vmem %s125_s6, 16  ;;  %s1695_s2 = scalar_lea.vmem %s125_s6, 32 }
  0x6b   :  { %p1692_p13 = scmp.ne.s32.totalorder %s125_s6, %s1691_s8  ;;  %p1696_p0 = scmp.lt.s32.totalorder %s125_s6, %s125_s6 }
  0x6c   :  { %p1697_p1 = scmp.lt.s32.totalorder %s1695_s2, %s1691_s8 }
  0x6e   :  { %p1698_p2 = por %p1697_p1, %p1696_p0 }
  0x70   :  { %p1699_p3 = pnand %p1698_p2, %p1692_p13 }
  0x72   :  { %1702 = shalt.err (!%p1699_p3)
}
  0x73   :  { %127 = dma.hbm_to_vmem [thread:$0]  %s2842_s29, 16, %s125_s6, [#allocation16]  }
  0x74   :  { %s2175_s23 = smov [#allocation18]   ;;  %s2176_s1 = smov [#allocation21]  }
  0x75   :  { %s146_s4 = sshll.u32 %s2175_s23, 4  ;;  %s168_s5 = sshll.u32 %s2176_s1, 4  ;;  %s147_s4 = int_to_ptr.vmem [resolvable:$true] %s146_s4  ;;  %s169_s5 = int_to_ptr.vmem [resolvable:$true] %s168_s5 }
  0x76   :  { %s1703_s22 = scalar_lea.hbm %s2801_s9, 16 }
  0x77   :  { %p1704_p4 = scmp.ne.s32.totalorder %s2801_s9, %s1703_s22  ;;  %p1707_p5 = scmp.lt.u32.totalorder %s1703_s22, %s2801_s9 }
  0x79   :  { %p1709_p6 = pnand %p1707_p5, %p1704_p4 }
  0x7b   :  { %1712 = shalt.err (!%p1709_p6)
}
  0x7c   :  { %s1713_s6 = scalar_lea.vmem %s147_s4, 16  ;;  %s1717_s29 = scalar_lea.vmem %s147_s4, 32 }
  0x7d   :  { %p1714_p7 = scmp.ne.s32.totalorder %s147_s4, %s1713_s6  ;;  %p1718_p8 = scmp.lt.s32.totalorder %s147_s4, %s147_s4 }
  0x7e   :  { %p1719_p9 = scmp.lt.s32.totalorder %s1717_s29, %s1713_s6 }
  0x80   :  { %p1720_p10 = por %p1719_p9, %p1718_p8 }
  0x82   :  { %p1721_p11 = pnand %p1720_p10, %p1714_p7 }
  0x84   :  { %1724 = shalt.err (!%p1721_p11)
}
  0x85   :  { %149 = dma.hbm_to_vmem [thread:$0]  %s2801_s9, 16, %s147_s4, [#allocation19]  }
  0x86   :  { %s1725_s1 = scalar_lea.hbm %s2803_s11, 16 }
  0x87   :  { %p1726_p12 = scmp.ne.s32.totalorder %s2803_s11, %s1725_s1  ;;  %p1729_p13 = scmp.lt.u32.totalorder %s1725_s1, %s2803_s11 }
  0x89   :  { %p1731_p0 = pnand %p1729_p13, %p1726_p12 }
  0x8b   :  { %1734 = shalt.err (!%p1731_p0)
}
  0x8c   :  { %s1735_s3 = scalar_lea.vmem %s169_s5, 16  ;;  %s1739_s25 = scalar_lea.vmem %s169_s5, 32 }
  0x8d   :  { %p1736_p1 = scmp.ne.s32.totalorder %s169_s5, %s1735_s3  ;;  %p1740_p2 = scmp.lt.s32.totalorder %s169_s5, %s169_s5 }
  0x8e   :  { %p1741_p3 = scmp.lt.s32.totalorder %s1739_s25, %s1735_s3 }
  0x90   :  { %p1742_p4 = por %p1741_p3, %p1740_p2 }
  0x92   :  { %p1743_p5 = pnand %p1742_p4, %p1736_p1 }
  0x94   :  { %1746 = shalt.err (!%p1743_p5)
}
  0x95   :  { %171 = dma.hbm_to_vmem [thread:$0]  %s2803_s11, 16, %s169_s5, [#allocation22]  }
  0x96   :  { %s2177_s8 = smov [#allocation24]   ;;  %s2178_s29 = smov [#allocation27]  }
  0x97   :  { %s190_s6 = sshll.u32 %s2177_s8, 4  ;;  %s212_s2 = sshll.u32 %s2178_s29, 4  ;;  %s191_s6 = int_to_ptr.vmem [resolvable:$true] %s190_s6  ;;  %s213_s2 = int_to_ptr.vmem [resolvable:$true] %s212_s2 }
  0x98   :  { %s1747_s23 = scalar_lea.hbm %s2805_s13, 16 }
  0x99   :  { %p1748_p6 = scmp.ne.s32.totalorder %s2805_s13, %s1747_s23  ;;  %p1751_p7 = scmp.lt.u32.totalorder %s1747_s23, %s2805_s13 }
  0x9b   :  { %p1753_p8 = pnand %p1751_p7, %p1748_p6 }
  0x9d   :  { %1756 = shalt.err (!%p1753_p8)
}
  0x9e   :  { %s1757_s11 = scalar_lea.vmem %s191_s6, 16  ;;  %s1761_s5 = scalar_lea.vmem %s191_s6, 32 }
  0x9f   :  { %p1758_p9 = scmp.ne.s32.totalorder %s191_s6, %s1757_s11  ;;  %p1762_p10 = scmp.lt.s32.totalorder %s191_s6, %s191_s6 }
  0xa0   :  { %p1763_p11 = scmp.lt.s32.totalorder %s1761_s5, %s1757_s11 }
  0xa2   :  { %p1764_p12 = por %p1763_p11, %p1762_p10 }
  0xa4   :  { %p1765_p13 = pnand %p1764_p12, %p1758_p9 }
  0xa6   :  { %1768 = shalt.err (!%p1765_p13)
}
  0xa7   :  { %193 = dma.hbm_to_vmem [thread:$0]  %s2805_s13, 16, %s191_s6, [#allocation25]  }
  0xa8   :  { %s1769_s4 = scalar_lea.hbm %s2807_s15, 16 }
  0xa9   :  { %p1770_p0 = scmp.ne.s32.totalorder %s2807_s15, %s1769_s4  ;;  %p1773_p1 = scmp.lt.u32.totalorder %s1769_s4, %s2807_s15 }
  0xab   :  { %p1775_p2 = pnand %p1773_p1, %p1770_p0 }
  0xad   :  { %1778 = shalt.err (!%p1775_p2)
}
  0xae   :  { %s1779_s23 = scalar_lea.vmem %s213_s2, 16  ;;  %s1783_s1 = scalar_lea.vmem %s213_s2, 32 }
  0xaf   :  { %p1780_p3 = scmp.ne.s32.totalorder %s213_s2, %s1779_s23  ;;  %p1784_p4 = scmp.lt.s32.totalorder %s213_s2, %s213_s2 }
  0xb0   :  { %p1785_p5 = scmp.lt.s32.totalorder %s1783_s1, %s1779_s23 }
  0xb2   :  { %p1786_p6 = por %p1785_p5, %p1784_p4 }
  0xb4   :  { %p1787_p7 = pnand %p1786_p6, %p1780_p3 }
  0xb6   :  { %1790 = shalt.err (!%p1787_p7)
}
  0xb7   :  { %215 = dma.hbm_to_vmem [thread:$0]  %s2807_s15, 16, %s213_s2, [#allocation28]  }
  0xb8   :  { %s2179_s27 = smov [#allocation30]   ;;  %s2180_s22 = smov [#allocation33]  }
  0xb9   :  { %s232_s30 = sshll.u32 %s2179_s27, 4  ;;  %s254_s11 = sshll.u32 %s2180_s22, 4  ;;  %s233_s30 = int_to_ptr.vmem [resolvable:$true] %s232_s30  ;;  %s255_s11 = int_to_ptr.vmem [resolvable:$true] %s254_s11 }
  0xba   :  { %s1791_s3 = scalar_lea.hbm %s2809_s17, 16 }
  0xbb   :  { %p1792_p8 = scmp.ne.s32.totalorder %s2809_s17, %s1791_s3  ;;  %p1795_p9 = scmp.lt.u32.totalorder %s1791_s3, %s2809_s17 }
  0xbd   :  { %p1797_p10 = pnand %p1795_p9, %p1792_p8 }
  0xbf   :  { %1800 = shalt.err (!%p1797_p10)
}
  0xc0   :  { %s1801_s15 = scalar_lea.vmem %s233_s30, 16  ;;  %s1805_s2 = scalar_lea.vmem %s233_s30, 32 }
  0xc1   :  { %p1802_p11 = scmp.ne.s32.totalorder %s233_s30, %s1801_s15  ;;  %p1806_p12 = scmp.lt.s32.totalorder %s233_s30, %s233_s30 }
  0xc2   :  { %p1807_p13 = scmp.lt.s32.totalorder %s1805_s2, %s1801_s15 }
  0xc4   :  { %p1808_p0 = por %p1807_p13, %p1806_p12 }
  0xc6   :  { %p1809_p1 = pnand %p1808_p0, %p1802_p11 }
  0xc8   :  { %1812 = shalt.err (!%p1809_p1)
}
  0xc9   :  { %235 = dma.hbm_to_vmem [thread:$0]  %s2809_s17, 16, %s233_s30, [#allocation31]  }
  0xca   :  { %s1813_s1 = scalar_lea.hbm %s2811_s19, 16 }
  0xcb   :  { %p1814_p2 = scmp.ne.s32.totalorder %s2811_s19, %s1813_s1  ;;  %p1817_p3 = scmp.lt.u32.totalorder %s1813_s1, %s2811_s19 }
  0xcd   :  { %p1819_p4 = pnand %p1817_p3, %p1814_p2 }
  0xcf   :  { %1822 = shalt.err (!%p1819_p4)
}
  0xd0   :  { %s1823_s5 = scalar_lea.vmem %s255_s11, 16  ;;  %s1827_s24 = scalar_lea.vmem %s255_s11, 32 }
  0xd1   :  { %p1824_p5 = scmp.ne.s32.totalorder %s255_s11, %s1823_s5  ;;  %p1828_p6 = scmp.lt.s32.totalorder %s255_s11, %s255_s11 }
  0xd2   :  { %p1829_p7 = scmp.lt.s32.totalorder %s1827_s24, %s1823_s5 }
  0xd4   :  { %p1830_p8 = por %p1829_p7, %p1828_p6 }
  0xd6   :  { %p1831_p9 = pnand %p1830_p8, %p1824_p5 }
  0xd8   :  { %1834 = shalt.err (!%p1831_p9)
}
  0xd9   :  { %257 = dma.hbm_to_vmem [thread:$0]  %s2811_s19, 16, %s255_s11, [#allocation34]  }
  0xda   :  { %s2181_s3 = smov [#allocation36]   ;;  %s2182_s9 = smov [#allocation3]  }
  0xdb   :  { %s276_s25 = sshll.u32 %s2181_s3, 4  ;;  %s50_s4 = sshll.u32 %s2182_s9, 4  ;;  %s277_s25 = int_to_ptr.vmem [resolvable:$true] %s276_s25  ;;  %s51_s4 = int_to_ptr.vmem [resolvable:$true] %s50_s4 }
  0xdc   :  { %s1835_s2 = scalar_lea.hbm %s2813_s21, 16 }
  0xdd   :  { %p1836_p10 = scmp.ne.s32.totalorder %s2813_s21, %s1835_s2  ;;  %p1839_p11 = scmp.lt.u32.totalorder %s1835_s2, %s2813_s21 }
  0xdf   :  { %p1841_p12 = pnand %p1839_p11, %p1836_p10 }
  0xe1   :  { %1844 = shalt.err (!%p1841_p12)
}
  0xe2   :  { %s1845_s19 = scalar_lea.vmem %s277_s25, 16  ;;  %s1849_s11 = scalar_lea.vmem %s277_s25, 32 }
  0xe3   :  { %p1846_p13 = scmp.ne.s32.totalorder %s277_s25, %s1845_s19  ;;  %p1850_p0 = scmp.lt.s32.totalorder %s277_s25, %s277_s25 }
  0xe4   :  { %p1851_p1 = scmp.lt.s32.totalorder %s1849_s11, %s1845_s19 }
  0xe6   :  { %p1852_p2 = por %p1851_p1, %p1850_p0 }
  0xe8   :  { %p1853_p3 = pnand %p1852_p2, %p1846_p13 }
  0xea   :  { %1856 = shalt.err (!%p1853_p3)
}
  0xeb   :  { %279 = dma.hbm_to_vmem [thread:$0]  %s2813_s21, 16, %s277_s25, [#allocation37]  }
  0xec   :  { %s2843_s22 = sld [smem:[#allocation53_spill]] }
  0xf2   :  { %s1857_s5 = scalar_lea.hbm %s2843_s22, 128 }
  0xf3   :  { %p1858_p4 = scmp.ne.s32.totalorder %s2843_s22, %s1857_s5  ;;  %p1861_p5 = scmp.lt.u32.totalorder %s1857_s5, %s2843_s22 }
  0xf5   :  { %p1863_p6 = pnand %p1861_p5, %p1858_p4 }
  0xf7   :  { %1866 = shalt.err (!%p1863_p6)
}
  0xf8   :  { %s1867_s9 = scalar_lea.vmem %s51_s4, 128  ;;  %p1872_p8 = scmp.lt.s32.totalorder %s51_s4, %s51_s4 }
  0xf9   :  { %p1868_p7 = scmp.ne.s32.totalorder %s51_s4, %s1867_s9  ;;  %p1873_p9 = scmp.lt.s32.totalorder %s1867_s9, %s1867_s9 }
  0xfb   :  { %p1874_p10 = por %p1873_p9, %p1872_p8 }
  0xfd   :  { %p1875_p11 = pnand %p1874_p10, %p1868_p7 }
  0xff   :  { %1878 = shalt.err (!%p1875_p11)
}
 0x100   :  { %53 = dma.hbm_to_vmem [thread:$0]  %s2843_s22, 128, %s51_s4, [#allocation4]  }
 0x101   :  { %s2183_s8 = smov [#allocation8]   ;;  %s2184_s2 = smov [#allocation11]  }
 0x102   :  { %s70_s15 = sshll.u32 %s2183_s8, 4  ;;  %s91_s29 = sshll.u32 %s2184_s2, 4  ;;  %s71_s15 = int_to_ptr.vmem [resolvable:$true] %s70_s15  ;;  %s2486_s29 = int_to_ptr.vmem [resolvable:$true] %s91_s29 }
 0x103   :  { %s2844_s23 = sld [smem:[#allocation55_spill]] }
 0x109   :  { %s1879_s19 = scalar_lea.hbm %s2844_s23, 16 }
 0x10a   :  { %p1880_p12 = scmp.ne.s32.totalorder %s2844_s23, %s1879_s19  ;;  %p1883_p13 = scmp.lt.u32.totalorder %s1879_s19, %s2844_s23 }
 0x10c   :  { %p1885_p0 = pnand %p1883_p13, %p1880_p12 }
 0x10e   :  { %1888 = shalt.err (!%p1885_p0)
}
 0x10f   :  { %s1889_s4 = scalar_lea.vmem %s71_s15, 16  ;;  %s1893_s27 = scalar_lea.vmem %s71_s15, 32 }
 0x110   :  { %p1890_p1 = scmp.ne.s32.totalorder %s71_s15, %s1889_s4  ;;  %p1894_p2 = scmp.lt.s32.totalorder %s71_s15, %s71_s15 }
 0x111   :  { %p1895_p3 = scmp.lt.s32.totalorder %s1893_s27, %s1889_s4 }
 0x113   :  { %p1896_p4 = por %p1895_p3, %p1894_p2 }
 0x115   :  { %p1897_p5 = pnand %p1896_p4, %p1890_p1 }
 0x117   :  { %1900 = shalt.err (!%p1897_p5)
}
 0x118   :  { %73 = dma.hbm_to_vmem [thread:$0]  %s2844_s23, 16, %s71_s15, [#allocation7]  }
 0x119   :  { %s2845_s30 = sld [smem:[#allocation57_spill]] }
 0x11f   :  { %s1901_s3 = scalar_lea.hbm %s2845_s30, 256 }
 0x120   :  { %p1902_p6 = scmp.ne.s32.totalorder %s2845_s30, %s1901_s3  ;;  %p1905_p7 = scmp.lt.u32.totalorder %s1901_s3, %s2845_s30 }
 0x122   :  { %p1907_p8 = pnand %p1905_p7, %p1902_p6 }
 0x124   :  { %1910 = shalt.err (!%p1907_p8)
}
 0x125   :  { %s1911_s2 = scalar_lea.vmem %s2486_s29, 256  ;;  %p1916_p10 = scmp.lt.s32.totalorder %s2486_s29, %s2486_s29 }
 0x126   :  { %p1912_p9 = scmp.ne.s32.totalorder %s2486_s29, %s1911_s2  ;;  %p1917_p11 = scmp.lt.s32.totalorder %s1911_s2, %s1911_s2 }
 0x128   :  { %p1918_p12 = por %p1917_p11, %p1916_p10 }
 0x12a   :  { %p1919_p13 = pnand %p1918_p12, %p1912_p9 }
 0x12c   :  { %1922 = shalt.err (!%p1919_p13)
}
 0x12d   :  { %97 = dma.hbm_to_vmem [thread:$0]  %s2845_s30, 256, %s2486_s29, [#allocation10], %s2171_s28, %s2171_s28, %s2172_s0  }
 0x12e   :  { %s2185_s7 = smov [#allocation14]   ;;  %s2186_s19 = smov [#allocation17]  }
 0x12f   :  { %s114_s23 = sshll.u32 %s2185_s7, 4  ;;  %s133_s11 = sshll.u32 %s2186_s19, 4  ;;  %s115_s23 = int_to_ptr.vmem [resolvable:$true] %s114_s23  ;;  %s2520_s11 = int_to_ptr.vmem [resolvable:$true] %s133_s11 }
 0x130   :  { %s2846_s6 = sld [smem:[#allocation59_spill]] }
 0x136   :  { %s1923_s4 = scalar_lea.hbm %s2846_s6, 16 }
 0x137   :  { %p1924_p0 = scmp.ne.s32.totalorder %s2846_s6, %s1923_s4  ;;  %p1927_p1 = scmp.lt.u32.totalorder %s1923_s4, %s2846_s6 }
 0x139   :  { %p1929_p2 = pnand %p1927_p1, %p1924_p0 }
 0x13b   :  { %1932 = shalt.err (!%p1929_p2)
}
 0x13c   :  { %s1933_s29 = scalar_lea.vmem %s115_s23, 16  ;;  %s1937_s17 = scalar_lea.vmem %s115_s23, 32 }
 0x13d   :  { %p1934_p3 = scmp.ne.s32.totalorder %s115_s23, %s1933_s29  ;;  %p1938_p4 = scmp.lt.s32.totalorder %s115_s23, %s115_s23 }
 0x13e   :  { %p1939_p5 = scmp.lt.s32.totalorder %s1937_s17, %s1933_s29 }
 0x140   :  { %p1940_p6 = por %p1939_p5, %p1938_p4 }
 0x142   :  { %p1941_p7 = pnand %p1940_p6, %p1934_p3 }
 0x144   :  { %1944 = shalt.err (!%p1941_p7)
}
 0x145   :  { %117 = dma.hbm_to_vmem [thread:$0]  %s2846_s6, 16, %s115_s23, [#allocation13]  }
 0x146   :  { %s2847_s25 = sld [smem:[#allocation61_spill]] }
 0x14c   :  { %s1945_s8 = scalar_lea.hbm %s2847_s25, 512 }
 0x14d   :  { %p1946_p8 = scmp.ne.s32.totalorder %s2847_s25, %s1945_s8  ;;  %p1949_p9 = scmp.lt.u32.totalorder %s1945_s8, %s2847_s25 }
 0x14f   :  { %p1951_p10 = pnand %p1949_p9, %p1946_p8 }
 0x151   :  { %1954 = shalt.err (!%p1951_p10)
}
 0x152   :  { %s1955_s19 = scalar_lea.vmem %s2520_s11, 512  ;;  %p1960_p12 = scmp.lt.s32.totalorder %s2520_s11, %s2520_s11 }
 0x153   :  { %p1956_p11 = scmp.ne.s32.totalorder %s2520_s11, %s1955_s19  ;;  %p1961_p13 = scmp.lt.s32.totalorder %s1955_s19, %s1955_s19 }
 0x155   :  { %p1962_p0 = por %p1961_p13, %p1960_p12 }
 0x157   :  { %p1963_p1 = pnand %p1962_p0, %p1956_p11 }
 0x159   :  { %1966 = shalt.err (!%p1963_p1)
}
 0x15a   :  { %139 = dma.hbm_to_vmem [thread:$0]  %s2847_s25, 512, %s2520_s11, [#allocation16], %s2171_s28, %s2171_s28, %s2172_s0  }
 0x15b   :  { %s2187_s13 = smov [#allocation20]   ;;  %s2188_s4 = smov [#allocation23]  }
 0x15c   :  { %s155_s6 = sshll.u32 %s2187_s13, 4  ;;  %s177_s27 = sshll.u32 %s2188_s4, 4  ;;  %s156_s6 = int_to_ptr.vmem [resolvable:$true] %s155_s6  ;;  %s2554_s27 = int_to_ptr.vmem [resolvable:$true] %s177_s27 }
 0x15d   :  { %s1967_s24 = scalar_lea.hbm %s2802_s10, 512 }
 0x15e   :  { %p1968_p2 = scmp.ne.s32.totalorder %s2802_s10, %s1967_s24  ;;  %p1971_p3 = scmp.lt.u32.totalorder %s1967_s24, %s2802_s10 }
 0x160   :  { %p1973_p4 = pnand %p1971_p3, %p1968_p2 }
 0x162   :  { %1976 = shalt.err (!%p1973_p4)
}
 0x163   :  { %s1977_s11 = scalar_lea.vmem %s156_s6, 512  ;;  %p1982_p6 = scmp.lt.s32.totalorder %s156_s6, %s156_s6 }
 0x164   :  { %p1978_p5 = scmp.ne.s32.totalorder %s156_s6, %s1977_s11  ;;  %p1983_p7 = scmp.lt.s32.totalorder %s1977_s11, %s1977_s11 }
 0x166   :  { %p1984_p8 = por %p1983_p7, %p1982_p6 }
 0x168   :  { %p1985_p9 = pnand %p1984_p8, %p1978_p5 }
 0x16a   :  { %1988 = shalt.err (!%p1985_p9)
}
 0x16b   :  { %161 = dma.hbm_to_vmem [thread:$0]  %s2802_s10, 512, %s156_s6, [#allocation19], %s2171_s28, %s2171_s28, %s2172_s0  }
 0x16c   :  { %s1989_s2 = scalar_lea.hbm %s2804_s12, 512 }
 0x16d   :  { %p1990_p10 = scmp.ne.s32.totalorder %s2804_s12, %s1989_s2  ;;  %p1993_p11 = scmp.lt.u32.totalorder %s1989_s2, %s2804_s12 }
 0x16f   :  { %p1995_p12 = pnand %p1993_p11, %p1990_p10 }
 0x171   :  { %1998 = shalt.err (!%p1995_p12)
}
 0x172   :  { %s1999_s23 = scalar_lea.vmem %s2554_s27, 512  ;;  %p2004_p0 = scmp.lt.s32.totalorder %s2554_s27, %s2554_s27 }
 0x173   :  { %p2000_p13 = scmp.ne.s32.totalorder %s2554_s27, %s1999_s23  ;;  %p2005_p1 = scmp.lt.s32.totalorder %s1999_s23, %s1999_s23 }
 0x175   :  { %p2006_p2 = por %p2005_p1, %p2004_p0 }
 0x177   :  { %p2007_p3 = pnand %p2006_p2, %p2000_p13 }
 0x179   :  { %2010 = shalt.err (!%p2007_p3)
}
 0x17a   :  { %183 = dma.hbm_to_vmem [thread:$0]  %s2804_s12, 512, %s2554_s27, [#allocation22], %s2171_s28, %s2171_s28, %s2172_s0  }
 0x17b   :  { %s2189_s13 = smov [#allocation26]   ;;  %s2190_s4 = smov [#allocation29]  }
 0x17c   :  { %s199_s6 = sshll.u32 %s2189_s13, 4  ;;  %s222_s22 = sshll.u32 %s2190_s4, 4  ;;  %s200_s6 = int_to_ptr.vmem [resolvable:$true] %s199_s6  ;;  %s223_s22 = int_to_ptr.vmem [resolvable:$true] %s222_s22 }
 0x17d   :  { %s2011_s29 = scalar_lea.hbm %s2806_s14, 512 }
 0x17e   :  { %p2012_p4 = scmp.ne.s32.totalorder %s2806_s14, %s2011_s29  ;;  %p2015_p5 = scmp.lt.u32.totalorder %s2011_s29, %s2806_s14 }
 0x180   :  { %p2017_p6 = pnand %p2015_p5, %p2012_p4 }
 0x182   :  { %2020 = shalt.err (!%p2017_p6)
}
 0x183   :  { %s2021_s12 = scalar_lea.vmem %s200_s6, 512  ;;  %p2026_p8 = scmp.lt.s32.totalorder %s200_s6, %s200_s6 }
 0x184   :  { %p2022_p7 = scmp.ne.s32.totalorder %s200_s6, %s2021_s12  ;;  %p2027_p9 = scmp.lt.s32.totalorder %s2021_s12, %s2021_s12 }
 0x186   :  { %p2028_p10 = por %p2027_p9, %p2026_p8 }
 0x188   :  { %p2029_p11 = pnand %p2028_p10, %p2022_p7 }
 0x18a   :  { %2032 = shalt.err (!%p2029_p11)
}
 0x18b   :  { %205 = dma.hbm_to_vmem [thread:$0]  %s2806_s14, 512, %s200_s6, [#allocation25], %s2171_s28, %s2171_s28, %s2172_s0  }
 0x18c   :  { %s2033_s8 = scalar_lea.hbm %s2808_s16, 16 }
 0x18d   :  { %p2034_p12 = scmp.ne.s32.totalorder %s2808_s16, %s2033_s8  ;;  %p2037_p13 = scmp.lt.u32.totalorder %s2033_s8, %s2808_s16 }
 0x18f   :  { %p2039_p0 = pnand %p2037_p13, %p2034_p12 }
 0x191   :  { %2042 = shalt.err (!%p2039_p0)
}
 0x192   :  { %s2043_s19 = scalar_lea.vmem %s223_s22, 16  ;;  %s2047_s23 = scalar_lea.vmem %s223_s22, 32 }
 0x193   :  { %p2044_p1 = scmp.ne.s32.totalorder %s223_s22, %s2043_s19  ;;  %p2048_p2 = scmp.lt.s32.totalorder %s223_s22, %s223_s22 }
 0x194   :  { %p2049_p3 = scmp.lt.s32.totalorder %s2047_s23, %s2043_s19 }
 0x196   :  { %p2050_p4 = por %p2049_p3, %p2048_p2 }
 0x198   :  { %p2051_p5 = pnand %p2050_p4, %p2044_p1 }
 0x19a   :  { %2054 = shalt.err (!%p2051_p5)
}
 0x19b   :  { %225 = dma.hbm_to_vmem [thread:$0]  %s2808_s16, 16, %s223_s22, [#allocation28]  }
 0x19c   :  { %s2191_s1 = smov [#allocation32]   ;;  %s2192_s6 = smov [#allocation35]  }
 0x19d   :  { %s241_s13 = sshll.u32 %s2191_s1, 4  ;;  %s263_s4 = sshll.u32 %s2192_s6, 4  ;;  %s242_s13 = int_to_ptr.vmem [resolvable:$true] %s241_s13  ;;  %s2618_s4 = int_to_ptr.vmem [resolvable:$true] %s263_s4 }
 0x19e   :  { %s2055_s29 = scalar_lea.hbm %s2810_s18, 512 }
 0x19f   :  { %p2056_p6 = scmp.ne.s32.totalorder %s2810_s18, %s2055_s29  ;;  %p2059_p7 = scmp.lt.u32.totalorder %s2055_s29, %s2810_s18 }
 0x1a1   :  { %p2061_p8 = pnand %p2059_p7, %p2056_p6 }
 0x1a3   :  { %2064 = shalt.err (!%p2061_p8)
}
 0x1a4   :  { %s2065_s16 = scalar_lea.vmem %s242_s13, 512  ;;  %p2070_p10 = scmp.lt.s32.totalorder %s242_s13, %s242_s13 }
 0x1a5   :  { %p2066_p9 = scmp.ne.s32.totalorder %s242_s13, %s2065_s16  ;;  %p2071_p11 = scmp.lt.s32.totalorder %s2065_s16, %s2065_s16 }
 0x1a7   :  { %p2072_p12 = por %p2071_p11, %p2070_p10 }
 0x1a9   :  { %p2073_p13 = pnand %p2072_p12, %p2066_p9 }
 0x1ab   :  { %2076 = shalt.err (!%p2073_p13)
}
 0x1ac   :  { %247 = dma.hbm_to_vmem [thread:$0]  %s2810_s18, 512, %s242_s13, [#allocation31], %s2171_s28, %s2171_s28, %s2172_s0  }
 0x1ad   :  { %s2077_s21 = scalar_lea.hbm %s2812_s20, 1024 }
 0x1ae   :  { %p2078_p0 = scmp.ne.s32.totalorder %s2812_s20, %s2077_s21  ;;  %p2081_p1 = scmp.lt.u32.totalorder %s2077_s21, %s2812_s20 }
 0x1b0   :  { %p2083_p2 = pnand %p2081_p1, %p2078_p0 }
 0x1b2   :  { %2086 = shalt.err (!%p2083_p2)
}
 0x1b3   :  { %s2087_s26 = scalar_lea.vmem %s2618_s4, 1024  ;;  %p2092_p4 = scmp.lt.s32.totalorder %s2618_s4, %s2618_s4 }
 0x1b4   :  { %p2088_p3 = scmp.ne.s32.totalorder %s2618_s4, %s2087_s26  ;;  %p2093_p5 = scmp.lt.s32.totalorder %s2087_s26, %s2087_s26 }
 0x1b6   :  { %p2094_p6 = por %p2093_p5, %p2092_p4 }
 0x1b8   :  { %p2095_p7 = pnand %p2094_p6, %p2088_p3 }
 0x1ba   :  { %2098 = shalt.err (!%p2095_p7)
}
 0x1bb   :  { %269 = dma.hbm_to_vmem [thread:$0]  %s2812_s20, 1024, %s2618_s4, [#allocation34], %s2171_s28, %s2171_s28, %s2172_s0  }
 0x1bc   :  { %s2193_s19 = smov [#allocation38]   ;;  %s2848_s1 = sld [smem:[#allocation62_spill]] }
 0x1bd   :  { %s285_s23 = sshll.u32 %s2193_s19, 4  ;;  %s286_s23 = int_to_ptr.vmem [resolvable:$true] %s285_s23 }
 0x1c2   :  { %s2099_s13 = scalar_lea.hbm %s2848_s1, 512 }
 0x1c3   :  { %p2100_p8 = scmp.ne.s32.totalorder %s2848_s1, %s2099_s13  ;;  %p2103_p9 = scmp.lt.u32.totalorder %s2099_s13, %s2848_s1 }
 0x1c5   :  { %p2105_p10 = pnand %p2103_p9, %p2100_p8 }
 0x1c7   :  { %2108 = shalt.err (!%p2105_p10)
}
 0x1c8   :  { %s2109_s17 = scalar_lea.vmem %s286_s23, 512  ;;  %p2114_p12 = scmp.lt.s32.totalorder %s286_s23, %s286_s23 }
 0x1c9   :  { %p2110_p11 = scmp.ne.s32.totalorder %s286_s23, %s2109_s17  ;;  %p2115_p13 = scmp.lt.s32.totalorder %s2109_s17, %s2109_s17 }
 0x1cb   :  { %p2116_p0 = por %p2115_p13, %p2114_p12 }
 0x1cd   :  { %p2117_p1 = pnand %p2116_p0, %p2110_p11 }
 0x1cf   :  { %2120 = shalt.err (!%p2117_p1)
}
 0x1d0   :  { %291 = dma.hbm_to_vmem [thread:$0]  %s2848_s1, 512, %s286_s23, [#allocation37], %s2171_s28, %s2171_s28, %s2172_s0  }
 0x1d1   :  { %2143 = dma.done.wait [#allocation4], 128  }
 0x1d2   :  { %2144 = vsyncadd [#allocation4], 4294967168 }
 0x1d3   :  { %2145 = dma.done.wait [#allocation7], 32  }
 0x1d4   :  { %2146 = vsyncadd [#allocation7], 4294967264 }
 0x1d5   :  { %2147 = dma.done.wait [#allocation10], 512  }
 0x1d6   :  { %2148 = vsyncadd [#allocation10], 4294966784 }
 0x1d7   :  { %2149 = dma.done.wait [#allocation13], 32  }
 0x1d8   :  { %2150 = vsyncadd [#allocation13], 4294967264 }
 0x1d9   :  { %2151 = dma.done.wait [#allocation16], 528  }
 0x1da   :  { %2152 = vsyncadd [#allocation16], 4294966768 }
 0x1db   :  { %2153 = dma.done.wait [#allocation19], 528  }
 0x1dc   :  { %2154 = vsyncadd [#allocation19], 4294966768 }
 0x1dd   :  { %2155 = dma.done.wait [#allocation22], 528  }
 0x1de   :  { %2156 = vsyncadd [#allocation22], 4294966768 }
 0x1df   :  { %2157 = dma.done.wait [#allocation25], 528  }
 0x1e0   :  { %2158 = vsyncadd [#allocation25], 4294966768 }
 0x1e1   :  { %2159 = dma.done.wait [#allocation28], 32  }
 0x1e2   :  { %2160 = vsyncadd [#allocation28], 4294967264 }
 0x1e3   :  { %2161 = dma.done.wait [#allocation31], 528  }
 0x1e4   :  { %2162 = vsyncadd [#allocation31], 4294966768 }
 0x1e5   :  { %2163 = dma.done.wait [#allocation34], 1040  }
 0x1e6   :  { %2164 = vsyncadd [#allocation34], 4294966256 }
 0x1e7   :  { %2165 = dma.done.wait [#allocation37], 528  }
 0x1e8   :  { %2166 = vsyncadd [#allocation37], 4294966768  ;;  %v2194_v1 = vmov 0   ;;  %v364_v2 = vld [vmem:[#allocation3] sm:$0xff]  ;;  %v599_v4 = vld [vmem:[#allocation9] sm:$0xff]  ;;  %v2195_v7 = vmov 0.0  }
 0x1e9   :  { %1600 = vset.pattern.permute.xlu0 %v2194_v1  ;;  %v365_v3 = vmul.f32 100.0, %v364_v2  ;;  %v600_v5 = vld [vmem:[#allocation9 + $0x8] sm:$0xff]  ;;  %v648_v6 = vld [vmem:[#allocation11] sm:$0xff]  ;;  %1461 = vmatprep.subr.bf16.mxu0 %v2195_v7  ;;  %v649_v9 = vld [vmem:[#allocation11 + $0x8] sm:$0xff]  ;;  %vm2196_vm0 = vmmov 0   ;;  %s2203_s28 = smov [#allocation39]  }
 0x1ea   :  { %1467 = vmatprep.subr.bf16.mxu1 %v2195_v7  ;;  %v602_v8 = vpack.c.bf16 %v600_v5, %v599_v4  ;;  %v651_v10 = vpack.c.bf16 %v649_v9, %v648_v6  ;;  %1463 = vmatprep.mubr.msk.bf16.mxu0 %vm2196_vm0, %v2195_v7  ;;  %v1391_v11 = vld [vmem:[#allocation6] ss:$0 sm:$0xff]  ;;  %v2197_v24 = vmov 683565275   ;;  %v2198_v26 = vmov 2475754826  }
 0x1eb   :  { %369 = vperm.xlu0 %1600, %v365_v3   ;;  %1469 = vmatprep.mubr.msk.bf16.mxu1 %vm2196_vm0, %v2195_v7  ;;  %v2199_v29 = vmov 2131351028   ;;  %v2200_v32 = vmov 2102212464   ;;  %v2201_v35 = vmov 920167782  }
 0x1ec   :  { %1462 = vmatpush3.bf16.msra.mxu0 %v602_v8  ;;  %1468 = vmatpush3.bf16.msra.mxu1 %v651_v10  ;;  %v2202_v38 = vmov 1326507024   ;;  %s1371_s0 = sshll.u32 %s2203_s28, 4  ;;  %s1372_s0 = int_to_ptr.vmem [resolvable:$true] %s1371_s0 }
 0x1ed   :  { %1473 = vmatprep.subr.bf16.mxu0 %v2195_v7  ;;  %1481 = vmatprep.subr.bf16.mxu1 %v2195_v7  ;;  %s2121_s30 = scalar_lea.vmem %s1372_s0, 128  ;;  %p2126_p3 = scmp.lt.s32.totalorder %s1372_s0, %s1372_s0 }
 0x1ee   :  { %p2122_p2 = scmp.ne.s32.totalorder %s1372_s0, %s2121_s30  ;;  %p2127_p4 = scmp.lt.s32.totalorder %s2121_s30, %s2121_s30 }
 0x1ef   :  { %589 = vperm.xlu0 %1600, %v364_v2  }
 0x1f0   :  { %p2128_p5 = por %p2127_p4, %p2126_p3 }
 0x1f2   :  { %p2129_p6 = pnand %p2128_p5, %p2122_p2 }
 0x26a   :  { %v370_v12 = vpop.permute.xlu0 %369 }
 0x26b   :  { %v2678_v13 = vmul.f32 %v1391_v11, %v370_v12 }
 0x26d   :  { %v382_v14 = vand.u32 2139095040, %v2678_v13  ;;  %v379_v18 = vand.u32 2147483647, %v2678_v13  ;;  %vm381_vm8 = vcmp.lt.s32.totalorder %v2678_v13, 0 }
 0x26f   :  { %v383_v15 = vshrl.u32 %v382_v14, 23  ;;  %v386_v21 = vand.u32 8388607, %v379_v18  ;;  %vm380_vm9 = vcmp.le.f32.partialorder %v379_v18, 0.7853982 }
 0x271   :  { %v1392_v16 = vadd.s32 4294967169, %v383_v15  ;;  %v387_v40 = vor.u32 8388608, %v386_v21 }
 0x273   :  { %v389_v17 = vadd.s32 1, %v1392_v16  ;;  %v427_v54 = vshll.u32 %v387_v40, 8 }
 0x275   :  { %vm390_vm1 = vcmp.gt.s32.totalorder %v389_v17, 0 }
 0x276   :  { %v391_v19 = vsel %vm390_vm1, %v389_v17, 0  ;;  %vm471_vm1 = vweird.f32 %v2678_v13 }
 0x277   :  { %v393_v20 = vand.u32 31, %v391_v19  ;;  %v392_v23 = vshrl.u32 %v391_v19, 5 }
 0x279   :  { %v394_v22 = vsub.s32 32, %v393_v20  ;;  %v396_v25 = vshll.u32 %v2197_v24, %v393_v20  ;;  %v399_v27 = vshll.u32 %v2198_v26, %v393_v20  ;;  %v402_v31 = vshll.u32 %v2199_v29, %v393_v20 }
 0x27a   :  { %v405_v34 = vshll.u32 %v2200_v32, %v393_v20  ;;  %v408_v37 = vshll.u32 %v2201_v35, %v393_v20  ;;  %vm411_vm2 = vcmp.lt.s32.totalorder %v392_v23, 1  ;;  %vm414_vm3 = vcmp.lt.s32.totalorder %v392_v23, 4 }
 0x27b   :  { %v397_v28 = vshrl.u32 %v2198_v26, %v394_v22  ;;  %v400_v30 = vshrl.u32 %v2199_v29, %v394_v22  ;;  %v403_v33 = vshrl.u32 %v2200_v32, %v394_v22  ;;  %v406_v36 = vshrl.u32 %v2201_v35, %v394_v22 }
 0x27c   :  { %v409_v39 = vshrl.u32 %v2202_v38, %v394_v22  ;;  %v395_v49 = vshrl.u32 %v2197_v24, %v394_v22  ;;  %vm413_vm4 = vcmp.lt.s32.totalorder %v392_v23, 3  ;;  %vm412_vm5 = vcmp.lt.s32.totalorder %v392_v23, 2 }
 0x27d   :  { %v398_v41 = vor.u32 %v397_v28, %v396_v25  ;;  %v401_v42 = vor.u32 %v400_v30, %v399_v27  ;;  %v404_v43 = vor.u32 %v403_v33, %v402_v31  ;;  %v407_v44 = vor.u32 %v406_v36, %v405_v34 }
 0x27e   :  { %v410_v45 = vor.u32 %v409_v39, %v408_v37 }
 0x27f   :  { %v416_v46 = vsel %vm414_vm3, %v404_v43, 2102212464  ;;  %v419_v47 = vsel %vm411_vm2, %v398_v41, %v401_v42  ;;  %v423_v48 = vsel %vm411_vm2, %v401_v42, %v404_v43  ;;  %v420_v50 = vsel %vm414_vm3, %v407_v44, 920167782 }
 0x280   :  { %v424_v51 = vsel %vm414_vm3, %v410_v45, 1326507024  ;;  %v421_v52 = vsel %vm413_vm4, %v404_v43, %v420_v50  ;;  %v415_v55 = vsel %vm411_vm2, %v395_v49, %v398_v41  ;;  %v417_v56 = vsel %vm413_vm4, %v401_v42, %v416_v46  ;;  %v590_v50 = vpop.permute.xlu0 %589 }
 0x281   :  { %v425_v53 = vsel %vm413_vm4, %v407_v44, %v424_v51  ;;  %v422_v57 = vsel %vm412_vm5, %v419_v47, %v421_v52  ;;  %v418_v63 = vsel %vm412_vm5, %v415_v55, %v417_v56  ;;  %vm603_vm2 = vcmask 130048  }
 0x282   :  { %v426_v58 = vsel %vm412_vm5, %v423_v48, %v425_v53  ;;  %v2687_v61 = vmul.u32.u64.low %v427_v54, %v422_v57  ;;  %v2688_v62 = vmul.u32.u64.high %v427_v54, %v422_v57, %v2687_v61  ;;  %v434_v1 = vmul.u32 %v427_v54, %v418_v63  ;;  %v1403_v57 = vld [vmem:[#allocation12] ss:$0 sm:$0xff] }
 0x283   :  { %v2684_v59 = vmul.u32.u64.low %v427_v54, %v426_v58  ;;  %v2685_v60 = vmul.u32.u64.high %v427_v54, %v426_v58, %v2684_v59  ;;  %vm706_vm3 = vcmask 261120   ;;  %vm1051_vm4 = vcmask 1043456  }
 0x284   :  { %v437_v0 = vadd.s32 1, %v2688_v62  ;;  %vm1034_vm5 = vcmask 64512  }
 0x285   :  { %vm436_vm6 = vc.u32 %v2685_v60, %v2687_v61  ;;  %v435_v15 = vadd.s32 %v2687_v61, %v2685_v60 }
 0x286   :  { %v438_v2 = vsel %vm436_vm6, %v437_v0, %v2688_v62  ;;  %vm1363_vm6 = vcmask 7168  }
 0x287   :  { %v439_v3 = vadd.s32 %v438_v2, %v434_v1 }
 0x289   :  { %v440_v4 = vadd.s32 536870912, %v439_v3 }
 0x28b   :  { %v441_v5 = vshrl.u32 %v440_v4, 30 }
 0x28d   :  { %v442_v6 = vshll.u32 %v441_v5, 30  ;;  %v465_v28 = vsub.s32 4, %v441_v5 }
 0x28f   :  { %v443_v8 = vsub.s32 %v439_v3, %v442_v6  ;;  %v466_v31 = vsel %vm381_vm8, %v465_v28, %v441_v5  ;;  %v792_v6 = vld [vmem:[#allocation20] sm:$0xff] }
 0x290   :  { %v468_v33 = vsel %vm380_vm9, 0, %v466_v31 }
 0x291   :  { %v445_v9 = vsub.s32 0, %v443_v8  ;;  %v472_v34 = vadd.s32 3, %v468_v33  ;;  %v576_v36 = vand.u32 3, %v468_v33 }
 0x293   :  { %v1393_v10 = vmin.u32 %v445_v9, %v443_v8  ;;  %v473_v35 = vand.u32 3, %v472_v34  ;;  %vm581_vm11 = vcmp.eq.s32.totalorder %v576_v36, 2  ;;  %vm578_vm13 = vcmp.eq.s32.totalorder %v576_v36, 0  ;;  %v847_v34 = vld [vmem:[#allocation23 + $0x10] sm:$0xff] }
 0x294   :  { %vm577_vm15 = vcmp.lt.s32.totalorder %v576_v36, 2 }
 0x295   :  { %v447_v11 = vclz %v1393_v10  ;;  %vm478_vm10 = vcmp.eq.s32.totalorder %v473_v35, 2  ;;  %vm475_vm12 = vcmp.eq.s32.totalorder %v473_v35, 0  ;;  %vm474_vm14 = vcmp.lt.s32.totalorder %v473_v35, 2  ;;  %v794_v10 = vld [vmem:[#allocation20 + $0x10] sm:$0xff]  ;;  %v848_v35 = vld [vmem:[#allocation23 + $0x18] sm:$0xff] }
 0x297   :  { %v1394_v12 = vadd.s32 4294967294, %v447_v11  ;;  %v795_v11 = vld [vmem:[#allocation20 + $0x18] sm:$0xff] }
 0x299   :  { %vm1395_vm7 = vcmp.lt.s32.totalorder %v1394_v12, 0 }
 0x29a   :  { %v450_v14 = vsel %vm1395_vm7, 0, %v1394_v12  ;;  %v797_v12 = vpack.c.bf16 %v795_v11, %v794_v10 }
 0x29b   :  { %v451_v16 = vsub.s32 32, %v450_v14  ;;  %v455_v17 = vsub.s32 4294967266, %v450_v14  ;;  %v452_v19 = vshll.u32 %v443_v8, %v450_v14  ;;  %v793_v8 = vld [vmem:[#allocation20 + $0x8] sm:$0xff]  ;;  %v735_v14 = vld [vmem:[#allocation17] sm:$0xff] }
 0x29c   :  { %v796_v9 = vpack.c.bf16 %v793_v8, %v792_v6 }
 0x29d   :  { %v453_v20 = vshrl.u32 %v435_v15, %v451_v16  ;;  %v456_v21 = vadd.s32 127, %v455_v17  ;;  %v736_v15 = vld [vmem:[#allocation17 + $0x8] sm:$0xff]  ;;  %v737_v17 = vld [vmem:[#allocation17 + $0x10] sm:$0xff] }
 0x29e   :  { %v740_v16 = vpack.c.bf16 %v736_v15, %v735_v14 }
 0x29f   :  { %v454_v22 = vor.u32 %v453_v20, %v452_v19  ;;  %v457_v23 = vshll.u32 %v456_v21, 23  ;;  %v738_v19 = vld [vmem:[#allocation17 + $0x18] sm:$0xff] }
 0x2a0   :  { %v741_v20 = vpack.c.bf16 %v738_v19, %v737_v17  ;;  %v980_v17 = vld [vmem:[#allocation26 + $0x8] sm:$0xff] }
 0x2a1   :  { %v458_v24 = vor.u32 4788187, %v457_v23  ;;  %v461_v26 = vcvt.s32.f32 %v454_v22 }
 0x2a3   :  { %v459_v25 = vand.u32 2147483647, %v458_v24 }
 0x2a5   :  { %v462_v27 = vmul.f32 %v461_v26, %v459_v25  ;;  %v1404_v25 = vld [vmem:[#allocation14] ss:$0 sm:$0xff] }
 0x2a7   :  { %v463_v29 = vxor.u32 2147483648, %v462_v27 }
 0x2a9   :  { %v464_v30 = vsel %vm381_vm8, %v463_v29, %v462_v27  ;;  %v1405_v27 = vld [vmem:[#allocation15] ss:$0 sm:$0xff]  ;;  %v845_v29 = vld [vmem:[#allocation23] sm:$0xff] }
 0x2aa   :  { %v467_v32 = vsel %vm380_vm9, %v2678_v13, %v464_v30  ;;  %v1400_v13 = vld [vmem:[#allocation8] ss:$0 sm:$0xff]  ;;  %v846_v30 = vld [vmem:[#allocation23 + $0x8] sm:$0xff] }
 0x2ab   :  { %1601 = vcosq.f32 %v467_v32  ;;  %v598_v51 = vmul.f32 %v1400_v13, %v590_v50  ;;  %v1406_v13 = vld [vmem:[#allocation18] ss:$0 sm:$0xff] }
 0x2ac   :  { %1603 = vsinq.f32 %v467_v32  ;;  %v849_v32 = vpack.c.bf16 %v846_v30, %v845_v29 }
 0x2b5   :  { %v1602_v37 = vpop.eup %1601 }
 0x2b6   :  { %v1604_v38 = vpop.eup %1603  ;;  %v479_v39 = vxor.u32 2147483648, %v1602_v37 }
 0x2b7   :  { %v476_v40 = vxor.u32 2147483648, %v1604_v38 }
 0x2b8   :  { %v480_v41 = vsel %vm478_vm10, %v479_v39, %v1604_v38  ;;  %v583_v18 = vsel %vm581_vm11, %v479_v39, %v1604_v38  ;;  %v1408_v39 = vld [vmem:[#allocation21] ss:$0 sm:$0xff] }
 0x2b9   :  { %v477_v42 = vsel %vm475_vm12, %v1602_v37, %v476_v40  ;;  %v580_v43 = vsel %vm578_vm13, %v1602_v37, %v476_v40  ;;  %v850_v37 = vpack.c.bf16 %v848_v35, %v847_v34 }
 0x2ba   :  { %v481_v44 = vsel %vm474_vm14, %v477_v42, %v480_v41  ;;  %v584_v45 = vsel %vm577_vm15, %v580_v43, %v583_v18 }
 0x2bb   :  { %v482_v46 = vsel %vm471_vm1, nan, %v481_v44  ;;  %v585_v47 = vsel %vm471_vm1, nan, %v584_v45 }
 0x2bc   :  { %v2699_v48 = vpack.c.bf16 %v482_v46, %v482_v46  ;;  %v2701_v49 = vpack.c.bf16 %v585_v47, %v585_v47 }
 0x2be   :  { %1464 = vmatmul.mubr.msk.bf16.vlgmr.msra.gmra.mrb[0].mxu0 %vm603_vm2, %v2699_v48  ;;  %1470 = vmatmul.mubr.msk.bf16.vlgmr.msra.gmra.mrb[0].mxu1 %vm603_vm2, %v2701_v49  ;;  %v653_v36 = vsel %vm603_vm2, %v2701_v49, 0  ;;  %v605_v38 = vsel %vm603_vm2, %v2699_v48, 0 }
 0x2bf   :  { %1477 = vmatprep.mubr.msk.bf16.mxu0 %vm2196_vm0, %v2195_v7  ;;  %1485 = vmatprep.mubr.msk.bf16.mxu1 %vm2196_vm0, %v2195_v7 }
 0x2c0   :  { %1482 = vmatpush3.bf16.msra.mxu1 %v796_v9  ;;  %1474 = vmatpush3.bf16.msra.mxu0 %v740_v16  ;;  %v979_v16 = vld [vmem:[#allocation26] sm:$0xff] }
 0x2c1   :  { %1483 = vmatprep.subr.bf16.mxu1 %v2195_v7  ;;  %1475 = vmatprep.subr.bf16.mxu0 %v2195_v7  ;;  %v1096_v19 = vpack.c.bf16 %v980_v17, %v979_v16 }
 0x2c4   :  { %1484 = vmatpush3.bf16.msra.mxu1 %v797_v12  ;;  %1476 = vmatpush3.bf16.msra.mxu0 %v741_v20 }
 0x2c5   :  { %1497 = vmatprep.subr.bf16.mxu1 %v2195_v7  ;;  %1489 = vmatprep.subr.bf16.mxu0 %v2195_v7 }
 0x391   :  { %v641_v52 = vpop.f32.mrb[0].mxu0  ;;  %v689_v53 = vpop.f32.mrb[0].mxu1 }
 0x392   :  { %v647_v54 = vadd.f32 %v641_v52, %v598_v51  ;;  %v1465_v55 = vpop.f32.mrb[1].mxu0  ;;  %v1471_v56 = vpop.f32.mrb[1].mxu1  ;;  %v1410_v51 = vld [vmem:[#allocation24] ss:$0 sm:$0xff] }
 0x393   :  { %v644_v58 = vpop.f32.mrb[2].mxu0  ;;  %v692_v59 = vpop.f32.mrb[2].mxu1 }
 0x394   :  { %v695_v60 = vadd.f32 %v689_v53, %v647_v54  ;;  %v1466_v61 = vpop.f32.mrb[3].mxu0  ;;  %v1472_v62 = vpop.f32.mrb[3].mxu1 }
 0x396   :  { %v2711_v63 = vadd.f32 %v1403_v57, %v695_v60 }
 0x398   :  { %v707_v0 = vsel %vm706_vm3, %v2711_v63, 0.0 }
 0x399   :  { %708 = vadd.xlane.f32.xlu1 %v707_v0 }
 0x426   :  { %v709_v1 = vpop.xlane.xlu1 %708 }
 0x427   :  { %v711_v2 = vmul.f32 0.03125, %v709_v1 }
 0x429   :  { %v712_v3 = vsub.f32 %v2711_v63, %v711_v2 }
 0x42b   :  { %v713_v4 = vmul.f32 %v712_v3, %v712_v3 }
 0x42d   :  { %v714_v5 = vsel %vm706_vm3, %v713_v4, 0.0 }
 0x42e   :  { %715 = vadd.xlane.f32.xlu1 %v714_v5 }
 0x4bb   :  { %v716_v21 = vpop.xlane.xlu1 %715 }
 0x4bc   :  { %v717_v22 = vmul.f32 0.03125, %v716_v21 }
 0x4be   :  { %v718_v23 = vadd.f32 1e-05, %v717_v22 }
 0x4c0   :  { %1605 = vrsqrt.f32 %v718_v23 }
 0x4ca   :  { %v1606_v24 = vpop.eup %1605 }
 0x4cb   :  { %v720_v26 = vmul.f32 %v1606_v24, %v712_v3  ;;  %v981_v24 = vld [vmem:[#allocation26 + $0x10] sm:$0xff] }
 0x4cd   :  { %v727_v28 = vmul.f32 %v1404_v25, %v720_v26  ;;  %v982_v25 = vld [vmem:[#allocation26 + $0x18] sm:$0xff] }
 0x4ce   :  { %v1097_v26 = vpack.c.bf16 %v982_v25, %v981_v24  ;;  %v1308_v25 = vld [vmem:[#allocation38 + $0x10] sm:$0xff] }
 0x4cf   :  { %v734_v31 = vadd.f32 %v1405_v27, %v727_v28 }
 0x4d1   :  { %v739_v33 = vpack.c.bf16 %v734_v31, %v734_v31 }
 0x4d3   :  { %1478 = vmatmul.mubr.msk.bf16.vlgmr.msra.gmra.mrb[4].mxu0 %vm706_vm3, %v739_v33  ;;  %1486 = vmatmul.mubr.msk.bf16.vlgmr.msra.gmra.mrb[4].mxu1 %vm706_vm3, %v739_v33 }
 0x4d4   :  { %1498 = vmatpush3.bf16.xpose.msra.mxu1 %v653_v36  ;;  %1490 = vmatpush3.bf16.msra.mxu0 %v849_v32  ;;  %v1417_v32 = vld [vmem:[#allocation27] ss:$0 sm:$0xff] }
 0x4d5   :  { %1491 = vmatprep.subr.bf16.mxu0 %v2195_v7  ;;  %1493 = vmatprep.mubr.msk.bf16.mxu0 %vm2196_vm0, %v2195_v7 }
 0x4d6   :  { %1499 = vmatprep.mubr.msk.bf16.mxu1 %vm2196_vm0, %v2195_v7  ;;  %1503 = vmatprep.subr.bf16.mxu1 %v2195_v7 }
 0x4d8   :  { %1492 = vmatpush3.bf16.msra.mxu0 %v850_v37 }
 0x4d9   :  { %1509 = vmatprep.subr.bf16.mxu0 %v2195_v7 }
 0x4db   :  { %1494 = vmatmul.mubr.msk.bf16.vlgmr.msra.gmra.mrb[8].mxu0 %vm706_vm3, %v739_v33  ;;  %1500 = vmatmul.mubr.msk.bf16.vlgmr.msra.gmra.mrb[8].mxu1 %vm603_vm2, %v2701_v49 }
 0x4dc   :  { %1504 = vmatpush3.bf16.xpose.msra.mxu1 %v605_v38  ;;  %1505 = vmatprep.mubr.msk.bf16.mxu1 %vm2196_vm0, %v2195_v7 }
 0x4dd   :  { %1511 = vmatprep.mubr.msk.bf16.mxu0 %vm2196_vm0, %v2195_v7  ;;  %1521 = vmatprep.subr.bf16.mxu1 %v2195_v7 }
 0x4e7   :  { %1506 = vmatmul.mubr.msk.bf16.vlgmr.msra.gmra.mrb[8].mxu1 %vm603_vm2, %v2699_v48 }
 0x4e8   :  { %1525 = vmatprep.mubr.msk.bf16.mxu1 %vm2196_vm0, %v2195_v7  ;;  %1522 = vmatpush3.bf16.msra.mxu1 %v1096_v19 }
 0x4e9   :  { %1523 = vmatprep.subr.bf16.mxu1 %v2195_v7 }
 0x4ec   :  { %1524 = vmatpush3.bf16.msra.mxu1 %v1097_v26  ;;  %v1309_v26 = vld [vmem:[#allocation38 + $0x18] sm:$0xff] }
 0x4ed   :  { %1537 = vmatprep.subr.bf16.mxu1 %v2195_v7 }
 0x5a6   :  { %v786_v40 = vpop.f32.mrb[4].mxu0  ;;  %v839_v41 = vpop.f32.mrb[4].mxu1 }
 0x5a7   :  { %v840_v18 = vadd.f32 %v1408_v39, %v839_v41  ;;  %v1479_v42 = vpop.f32.mrb[5].mxu0  ;;  %v1487_v43 = vpop.f32.mrb[5].mxu1  ;;  %v787_v48 = vadd.f32 %v1406_v13, %v786_v40 }
 0x5a8   :  { %v789_v44 = vpop.f32.mrb[6].mxu0  ;;  %v842_v45 = vpop.f32.mrb[6].mxu1 }
 0x5a9   :  { %v985_v46 = vpack.c.bf16 %v840_v18, %v840_v18  ;;  %v1480_v47 = vpop.f32.mrb[7].mxu0  ;;  %v1488_v49 = vpop.f32.mrb[7].mxu1  ;;  %v984_v56 = vpack.c.bf16 %v787_v48, %v787_v48  ;;  %v1178_v44 = vld [vmem:[#allocation32] sm:$0xff]  ;;  %v1179_v45 = vld [vmem:[#allocation32 + $0x8] sm:$0xff] }
 0x5aa   :  { %v1180_v47 = vld [vmem:[#allocation32 + $0x10] sm:$0xff] }
 0x5ab   :  { %v990_v50 = vsel %vm706_vm3, %v985_v46, 0  ;;  %v1183_v46 = vpack.c.bf16 %v1179_v45, %v1178_v44 }
 0x5ac   :  { %1510 = vmatpush3.bf16.xpose.msra.mxu0 %v990_v50 }
 0x5ad   :  { %1515 = vmatprep.subr.bf16.mxu0 %v2195_v7 }
 0x5ae   :  { %v892_v52 = vpop.f32.mrb[8].mxu0 }
 0x5af   :  { %v893_v53 = vadd.f32 %v1410_v51, %v892_v52  ;;  %v1495_v54 = vpop.f32.mrb[9].mxu0  ;;  %v1418_v52 = vld [vmem:[#allocation29] ss:$0 sm:$0xff] }
 0x5b0   :  { %v895_v55 = vpop.f32.mrb[10].mxu0  ;;  %v1419_v54 = vld [vmem:[#allocation30] ss:$0 sm:$0xff] }
 0x5b1   :  { %v1047_v57 = vpack.c.bf16 %v893_v53, %v893_v53  ;;  %v1496_v58 = vpop.f32.mrb[11].mxu0 }
 0x5b2   :  { %v1240_v58 = vld [vmem:[#allocation35] sm:$0xff] }
 0x5b3   :  { %v1053_v59 = vsel %vm1051_vm4, %v1047_v57, 0  ;;  %1512 = vmatmul.mubr.msk.bf16.vlgmr.msra.gmra.mrb[12].mxu0 %vm706_vm3, %v984_v56 }
 0x5b4   :  { %1516 = vmatpush3.bf16.msra.mxu0 %v1053_v59  ;;  %1517 = vmatprep.mubr.msk.bf16.mxu0 %vm2196_vm0, %v2195_v7  ;;  %v1241_v59 = vld [vmem:[#allocation35 + $0x8] sm:$0xff] }
 0x5b5   :  { %1529 = vmatprep.subr.bf16.mxu0 %v2195_v7 }
 0x5ba   :  { %v972_v60 = vpop.f32.mrb[8].mxu1 }
 0x5bb   :  { %v1507_v61 = vpop.f32.mrb[9].mxu1  ;;  %v978_v2 = vmul.f32 0.17677669, %v972_v60  ;;  %v1249_v60 = vpack.c.bf16 %v1241_v59, %v1240_v58 }
 0x5bc   :  { %v975_v62 = vpop.f32.mrb[10].mxu1  ;;  %v1242_v61 = vld [vmem:[#allocation35 + $0x10] sm:$0xff] }
 0x5bd   :  { %v1508_v0 = vpop.f32.mrb[11].mxu1  ;;  %v1243_v62 = vld [vmem:[#allocation35 + $0x18] sm:$0xff] }
 0x5be   :  { %v1250_v0 = vpack.c.bf16 %v1243_v62, %v1242_v61 }
 0x686   :  { %v1026_v1 = vpop.f32.mrb[12].mxu0 }
 0x687   :  { %v1032_v3 = vmul.f32 0.17677669, %v1026_v1  ;;  %v1513_v4 = vpop.f32.mrb[13].mxu0  ;;  %v1244_v1 = vld [vmem:[#allocation35 + $0x20] sm:$0xff] }
 0x688   :  { %v1029_v5 = vpop.f32.mrb[14].mxu0  ;;  %v1246_v4 = vld [vmem:[#allocation35 + $0x30] sm:$0xff] }
 0x689   :  { %v1514_v6 = vpop.f32.mrb[15].mxu0  ;;  %v1033_v8 = vadd.f32 %v1032_v3, %v978_v2  ;;  %v1245_v2 = vld [vmem:[#allocation35 + $0x28] sm:$0xff]  ;;  %v1247_v5 = vld [vmem:[#allocation35 + $0x38] sm:$0xff] }
 0x68a   :  { %v1251_v3 = vpack.c.bf16 %v1245_v2, %v1244_v1  ;;  %v1252_v6 = vpack.c.bf16 %v1247_v5, %v1246_v4 }
 0x68b   :  { %v1035_v9 = vsel %vm1034_vm5, %v1033_v8, -inf }
 0x68c   :  { %1036 = vmax.xlane.f32.xlu0 %v1035_v9 }
 0x719   :  { %v1037_v10 = vpop.xlane.xlu0 %1036 }
 0x71a   :  { %v1038_v11 = vsub.f32 %v1033_v8, %v1037_v10  ;;  %v1420_v8 = vld [vmem:[#allocation33] ss:$0 sm:$0xff] }
 0x71c   :  { %v1039_v12 = vmul.f32 1.442695, %v1038_v11 }
 0x71e   :  { %1607 = vpow2.f32 %v1039_v12 }
 0x728   :  { %v1608_v14 = vpop.eup %1607 }
 0x729   :  { %v1041_v15 = vsel %vm1034_vm5, %v1608_v14, 0.0 }
 0x72a   :  { %1042 = vadd.xlane.f32.xlu1 %v1041_v15 }
 0x7b7   :  { %v1043_v20 = vpop.xlane.xlu1 %1042 }
 0x7b8   :  { %1609 = vrcp.f32 %v1043_v20 }
 0x7c2   :  { %v1610_v21 = vpop.eup %1609 }
 0x7c3   :  { %v1045_v22 = vmul.f32 %v1610_v21, %v1608_v14 }
 0x7c5   :  { %v1046_v23 = vpack.c.bf16 %v1045_v22, %v1045_v22  ;;  %v1306_v22 = vld [vmem:[#allocation38] sm:$0xff] }
 0x7c7   :  { %1518 = vmatmul.mubr.msk.bf16.vlgmr.msra.gmra.mrb[16].mxu0 %vm1034_vm5, %v1046_v23  ;;  %v1307_v23 = vld [vmem:[#allocation38 + $0x8] sm:$0xff] }
 0x7c8   :  { %1533 = vmatprep.mubr.msk.bf16.mxu0 %vm2196_vm0, %v2195_v7  ;;  %1530 = vmatpush3.bf16.msra.mxu0 %v1183_v46  ;;  %v1311_v24 = vpack.c.bf16 %v1307_v23, %v1306_v22 }
 0x7c9   :  { %1531 = vmatprep.subr.bf16.mxu0 %v2195_v7 }
 0x89a   :  { %v1089_v27 = vpop.f32.mrb[16].mxu0 }
 0x89b   :  { %v1095_v28 = vpack.c.bf16 %v1089_v27, %v1089_v27  ;;  %v1519_v29 = vpop.f32.mrb[17].mxu0  ;;  %v1312_v27 = vpack.c.bf16 %v1309_v26, %v1308_v25 }
 0x89c   :  { %v1092_v30 = vpop.f32.mrb[18].mxu0  ;;  %v1423_v29 = vld [vmem:[#allocation36] ss:$0 sm:$0xff] }
 0x89d   :  { %v1520_v31 = vpop.f32.mrb[19].mxu0  ;;  %1526 = vmatmul.mubr.msk.bf16.vlgmr.msra.gmra.mrb[12].mxu1 %vm706_vm3, %v1095_v28 }
 0x89e   :  { %1545 = vmatprep.mubr.msk.bf16.mxu1 %vm2196_vm0, %v2195_v7  ;;  %1538 = vmatpush3.bf16.msra.mxu1 %v1249_v60 }
 0x89f   :  { %1539 = vmatprep.subr.bf16.mxu1 %v2195_v7 }
 0x8a2   :  { %1540 = vmatpush3.bf16.msra.mxu1 %v1250_v0 }
 0x8a3   :  { %1541 = vmatprep.subr.bf16.mxu1 %v2195_v7 }
 0x8a6   :  { %1542 = vmatpush3.bf16.msra.mxu1 %v1251_v3 }
 0x8a7   :  { %1543 = vmatprep.subr.bf16.mxu1 %v2195_v7 }
 0x8aa   :  { %1544 = vmatpush3.bf16.msra.mxu1 %v1252_v6 }
 0x970   :  { %v1135_v33 = vpop.f32.mrb[12].mxu1 }
 0x971   :  { %v1147_v34 = vadd.f32 %v1417_v32, %v1135_v33  ;;  %v1527_v35 = vpop.f32.mrb[13].mxu1 }
 0x972   :  { %v1138_v36 = vpop.f32.mrb[14].mxu1 }
 0x973   :  { %v2763_v37 = vadd.f32 %v1147_v34, %v2711_v63  ;;  %v1528_v38 = vpop.f32.mrb[15].mxu1  ;;  %v1181_v63 = vld [vmem:[#allocation32 + $0x18] sm:$0xff]  ;;  %v1424_v36 = vld [vmem:[#allocation2] ss:$0 sm:$0xff] }
 0x974   :  { %v1184_v49 = vpack.c.bf16 %v1181_v63, %v1180_v47 }
 0x975   :  { %v1151_v39 = vsel %vm706_vm3, %v2763_v37, 0.0 }
 0x976   :  { %1152 = vadd.xlane.f32.xlu1 %v1151_v39  ;;  %1532 = vmatpush3.bf16.msra.mxu0 %v1184_v49 }
 0x977   :  { %1549 = vmatprep.subr.bf16.mxu0 %v2195_v7 }
 0xa03   :  { %v1153_v40 = vpop.xlane.xlu1 %1152 }
 0xa04   :  { %v1154_v41 = vmul.f32 0.03125, %v1153_v40 }
 0xa06   :  { %v1155_v18 = vsub.f32 %v2763_v37, %v1154_v41 }
 0xa08   :  { %v1156_v42 = vmul.f32 %v1155_v18, %v1155_v18 }
 0xa0a   :  { %v1157_v43 = vsel %vm706_vm3, %v1156_v42, 0.0 }
 0xa0b   :  { %1158 = vadd.xlane.f32.xlu1 %v1157_v43 }
 0xa98   :  { %v1159_v13 = vpop.xlane.xlu1 %1158 }
 0xa99   :  { %v1160_v50 = vmul.f32 0.03125, %v1159_v13 }
 0xa9b   :  { %v1161_v51 = vadd.f32 1e-05, %v1160_v50 }
 0xa9d   :  { %1611 = vrsqrt.f32 %v1161_v51 }
 0xaa7   :  { %v1612_v48 = vpop.eup %1611 }
 0xaa8   :  { %v1163_v53 = vmul.f32 %v1612_v48, %v1155_v18 }
 0xaaa   :  { %v1170_v55 = vmul.f32 %v1418_v52, %v1163_v53 }
 0xaac   :  { %v1177_v56 = vadd.f32 %v1419_v54, %v1170_v55 }
 0xaae   :  { %v1182_v57 = vpack.c.bf16 %v1177_v56, %v1177_v56 }
 0xab0   :  { %1534 = vmatmul.mubr.msk.bf16.vlgmr.msra.gmra.mrb[20].mxu0 %vm706_vm3, %v1182_v57 }
 0xab1   :  { %1553 = vmatprep.mubr.msk.bf16.mxu0 %vm2196_vm0, %v2195_v7  ;;  %vm1253_vm0 = vcmask 523264   ;;  %1550 = vmatpush3.bf16.msra.mxu0 %v1311_v24 }
 0xab2   :  { %1551 = vmatprep.subr.bf16.mxu0 %v2195_v7 }
 0xab5   :  { %1552 = vmatpush3.bf16.msra.mxu0 %v1312_v27 }
 0xb83   :  { %v1229_v9 = vpop.f32.mrb[20].mxu0 }
 0xb84   :  { %v1230_v10 = vadd.f32 %v1420_v8, %v1229_v9  ;;  %v1535_v11 = vpop.f32.mrb[21].mxu0 }
 0xb85   :  { %v1232_v12 = vpop.f32.mrb[22].mxu0 }
 0xb86   :  { %v1236_v14 = vmul.f32 0.70710677, %v1230_v10  ;;  %v1536_v15 = vpop.f32.mrb[23].mxu0  ;;  %v1235_v17 = vmul.f32 0.5, %v1230_v10 }
 0xb88   :  { %1613 = verf.f32 %v1236_v14 }
 0xb92   :  { %v1614_v16 = vpop.eup %1613 }
 0xb93   :  { %v1238_v19 = vadd.f32 1.0, %v1614_v16 }
 0xb95   :  { %v1239_v20 = vmul.f32 %v1238_v19, %v1235_v17 }
 0xb97   :  { %v1248_v21 = vpack.c.bf16 %v1239_v20, %v1239_v20 }
 0xb99   :  { %1546 = vmatmul.mubr.msk.bf16.vlgmr.msra.gmra.mrb[16].mxu1 %vm1253_vm0, %v1248_v21 }
 0xc6c   :  { %v1291_v28 = vpop.f32.mrb[16].mxu1 }
 0xc6d   :  { %v1297_v30 = vadd.f32 %v1291_v28, %v2763_v37  ;;  %v1547_v31 = vpop.f32.mrb[17].mxu1 }
 0xc6e   :  { %v1294_v32 = vpop.f32.mrb[18].mxu1 }
 0xc6f   :  { %v1305_v33 = vadd.f32 %v1423_v29, %v1297_v30  ;;  %v1548_v34 = vpop.f32.mrb[19].mxu1 }
 0xc71   :  { %v1310_v35 = vpack.c.bf16 %v1305_v33, %v1305_v33 }
 0xc73   :  { %1554 = vmatmul.mubr.msk.bf16.vlgmr.msra.gmra.mrb[24].mxu0 %vm706_vm3, %v1310_v35 }
 0xd46   :  { %v1357_v38 = vpop.f32.mrb[24].mxu0 }
 0xd47   :  { %v1358_v7 = vadd.f32 %v1424_v36, %v1357_v38  ;;  %v1555_v39 = vpop.f32.mrb[25].mxu0 }
 0xd48   :  { %v1360_v40 = vpop.f32.mrb[26].mxu0 }
 0xd49   :  { %v1556_v41 = vpop.f32.mrb[27].mxu0  ;;  %1364 = vst.msk [vmem:[#allocation39] sm:$0xff] %vm1363_vm6, %v1358_v7 }
 0xd4a   :  { %2132 = shalt.err (!%p2129_p6)
}
 0xd4b   :  { %s2849_s16 = sld [smem:[#allocation63_spill]] }
 0xd51   :  { %s2133_s22 = scalar_lea.hbm %s2849_s16, 128 }
 0xd52   :  { %p2134_p7 = scmp.ne.s32.totalorder %s2849_s16, %s2133_s22  ;;  %p2137_p8 = scmp.lt.u32.totalorder %s2133_s22, %s2849_s16 }
 0xd54   :  { %p2139_p9 = pnand %p2137_p8, %p2134_p7 }
 0xd56   :  { %2142 = shalt.err (!%p2139_p9)
}
 0xd57   :  { %1374 = dma.vmem_to_hbm [thread:$0]  %s1372_s0, 128, %s2849_s16, [#allocation5]  }
 0xd58   :  { %2167 = dma.done.wait [#allocation5], 128  }
 0xd59   :  { %2168 = vsyncadd [#allocation5], 4294967168 }
 0xd5a   :  { %1378 = vsyncpa [#allocation4], 1 }
 0xd5b   :  { %1379 = vsyncpa [#allocation7], 1 }
 0xd5c   :  { %1380 = vsyncpa [#allocation10], 1 }
 0xd5d   :  { %1381 = vsyncpa [#allocation13], 1 }
 0xd5e   :  { %1382 = vsyncpa [#allocation16], 1 }
 0xd5f   :  { %1383 = vsyncpa [#allocation19], 1 }
 0xd60   :  { %1384 = vsyncpa [#allocation22], 1 }
 0xd61   :  { %1385 = vsyncpa [#allocation25], 1 }
 0xd62   :  { %1386 = vsyncpa [#allocation28], 1 }
 0xd63   :  { %1387 = vsyncpa [#allocation31], 1 }
 0xd64   :  { %1388 = vsyncpa [#allocation34], 1 }
 0xd65   :  { %1389 = vsyncpa [#allocation37], 1 }
 0xd66   :  { %1390 = vsyncpa [#allocation5], 1 }

</bundles_post_ra>
